<compile_context>
chip_gen: v5e
topology: v5e:2x2
jax: 0.10.0
libtpu: 0.0.40
codegen_flags: <defaults>
</compile_context>

<pallas_src>
import math
from functools import partial

import jax
import jax.numpy as jnp
from jax.experimental import pallas as pl
from jax.experimental.pallas import tpu as pltpu

HIDDEN_SIZE = 20            # H (PyTorch module default)
HIDDEN_PAD = 32             # H padded to sublane-aligned size (multiple of 8)
PREPROCESSING_FACTOR = 10.0
_THRESHOLD = math.exp(-PREPROCESSING_FACTOR)
_EXP_FACTOR = math.exp(PREPROCESSING_FACTOR)


def _sigmoid(x):
    # One EUP op (tanh) + cheap VALU ops instead of exp + reciprocal.
    return 0.5 * jnp.tanh(0.5 * x) + 0.5


def _lstm_cell(gates_in, h, c, whh, b):
    """Feature-major LSTM cell. gates_in: (4*HP, T); h, c: (HP, T); b: (4*HP, 1)."""
    HP = HIDDEN_PAD
    gates = gates_in + jnp.dot(whh, h, preferred_element_type=jnp.float32) + b
    i = _sigmoid(gates[0 * HP:1 * HP, :])
    f = _sigmoid(gates[1 * HP:2 * HP, :])
    g = jnp.tanh(gates[2 * HP:3 * HP, :])
    o = _sigmoid(gates[3 * HP:4 * HP, :])
    c_new = f * c + i * g
    h_new = o * jnp.tanh(c_new)
    return h_new, c_new


def optimizer_net_kernel(inp_ref, h0_ref, h1_ref, c0_ref, c1_ref,
                         wih1a_ref, wih1b_ref, whh1_ref, b1_ref,
                         wih2_ref, whh2_ref, b2_ref,
                         wout_ref, bout_ref,
                         out_ref, h0o_ref, h1o_ref, c0o_ref, c1o_ref):
    p = jnp.float32(PREPROCESSING_FACTOR)

    # --- gradient preprocessing (Andrychowicz et al.), lane-dense (1, T) rows ---
    x = inp_ref[...]                                   # (1, T)
    ax = jnp.abs(x)
    keep = ax >= jnp.float32(_THRESHOLD)
    col0 = jnp.where(keep, jnp.log(ax + 1e-8) / p, jnp.full_like(x, -1.0))
    # On the "keep" branch |x| >= exp(-p) > 0, so sign(x) is just the two-way
    # select below (cheaper / safer lowering than lax.sign).
    sgn = jnp.where(x >= 0.0, jnp.float32(1.0), jnp.float32(-1.0))
    col1 = jnp.where(keep, sgn, jnp.float32(_EXP_FACTOR) * x)

    # --- first cell input path: two broadcast FMAs instead of a K=2 MXU pass ---
    gates_in1 = wih1a_ref[...] * col0 + wih1b_ref[...] * col1      # (4*HP, T)

    h0, c0 = _lstm_cell(gates_in1, h0_ref[...], c0_ref[...],
                        whh1_ref[...], b1_ref[...])

    gates_in2 = jnp.dot(wih2_ref[...], h0, preferred_element_type=jnp.float32)
    h1, c1 = _lstm_cell(gates_in2, h1_ref[...], c1_ref[...],
                        whh2_ref[...], b2_ref[...])

    # --- output layer: elementwise mul + sublane reduce (no width-1 matmul) ---
    out_ref[...] = jnp.sum(h1 * wout_ref[...], axis=0, keepdims=True) + bout_ref[...]
    h0o_ref[...] = h0
    h1o_ref[...] = h1
    c0o_ref[...] = c0
    c1o_ref[...] = c1


def _tile_config(n, max_tile_n):
    n128 = ((max(n, 1) + 127) // 128) * 128
    return min(max_tile_n, n128)


@partial(jax.jit, static_argnames=("tile_n",))
def _forward_padded(inp, h0, h1, c0, c1, packed, tile_n):
    N = inp.shape[0]
    H, HP = HIDDEN_SIZE, HIDDEN_PAD
    n_pad = ((N + tile_n - 1) // tile_n) * tile_n
    grid = (n_pad // tile_n,)

    def to_kernel_layout(a, rows):
        at = jnp.asarray(a, jnp.float32).T               # features-major
        return jnp.pad(at, ((0, rows - at.shape[0]), (0, n_pad - N)))

    inp_t = to_kernel_layout(inp, 1)
    h0_t = to_kernel_layout(h0, HP)
    h1_t = to_kernel_layout(h1, HP)
    c0_t = to_kernel_layout(c0, HP)
    c1_t = to_kernel_layout(c1, HP)

    row_spec = pl.BlockSpec((1, tile_n), lambda i: (0, i))
    state_spec = pl.BlockSpec((HP, tile_n), lambda i: (0, i))
    const = lambda shape: pl.BlockSpec(shape, lambda i: (0, 0))   # VMEM-resident

    in_specs = [
        row_spec, state_spec, state_spec, state_spec, state_spec,
        const((4 * HP, 1)), const((4 * HP, 1)), const((4 * HP, HP)), const((4 * HP, 1)),
        const((4 * HP, HP)), const((4 * HP, HP)), const((4 * HP, 1)),
        const((HP, 1)), const((1, 1)),
    ]
    out_specs = (row_spec, state_spec, state_spec, state_spec, state_spec)
    out_shape = (
        jax.ShapeDtypeStruct((1, n_pad), jnp.float32),
        jax.ShapeDtypeStruct((HP, n_pad), jnp.float32),
        jax.ShapeDtypeStruct((HP, n_pad), jnp.float32),
        jax.ShapeDtypeStruct((HP, n_pad), jnp.float32),
        jax.ShapeDtypeStruct((HP, n_pad), jnp.float32),
    )

    flops = 2 * n_pad * (3 * 4 * HP * HP + 4 * HP * 2 + HP)
    transcendentals = n_pad * (10 * HP + 3)
    bytes_accessed = 4 * (n_pad * (8 * HP + 2)
                          + 3 * 4 * HP * HP + 4 * 4 * HP + HP + 1)

    out_p, h0_p, h1_p, c0_p, c1_p = pl.pallas_call(
        optimizer_net_kernel,
        grid=grid,
        in_specs=in_specs,
        out_specs=out_specs,
        out_shape=out_shape,
        input_output_aliases={1: 1, 2: 2, 3: 3, 4: 4},   # in-place LSTM state update
        compiler_params=pltpu.CompilerParams(
            dimension_semantics=("parallel",),
            vmem_limit_bytes=32 * 1024 * 1024,
        ),
        cost_estimate=pl.CostEstimate(
            flops=int(flops),
            transcendentals=int(transcendentals),
            bytes_accessed=int(bytes_accessed),
        ),
    )(inp_t, h0_t, h1_t, c0_t, c1_t,
      packed["wih1_a"], packed["wih1_b"], packed["whh1"], packed["b1"],
      packed["wih2"], packed["whh2"], packed["b2"],
      packed["wout"], packed["bout"])

    out = out_p[:, :N].T
    h0n = h0_p[:H, :N].T
    h1n = h1_p[:H, :N].T
    c0n = c0_p[:H, :N].T
    c1n = c1_p[:H, :N].T
    return out, (h0n, h1n), (c0n, c1n)


def optimizer_network_forward(inp, hidden, cell, packed_params, *, max_tile_n=1024):
    """inp: (N, 1); hidden/cell: tuples of two (N, H) arrays (PyTorch layout)."""
    tile_n = _tile_config(inp.shape[0], max_tile_n)
    return _forward_padded(inp, hidden[0], hidden[1], cell[0], cell[1],
                           packed_params, tile_n=tile_n)


# ---------------- parameters (PyTorch layout) + kernel-layout packing ----------------

def init_params(key, hidden_size=HIDDEN_SIZE):
    H = hidden_size
    bound = 1.0 / math.sqrt(H)
    keys = jax.random.split(key, 10)
    u = lambda kk, shape: jax.random.uniform(kk, shape, jnp.float32, -bound, bound)
    return {
        "w_ih1": u(keys[0], (4 * H, 2)),
        "w_hh1": u(keys[1], (4 * H, H)),
        "b_ih1": u(keys[2], (4 * H,)),
        "b_hh1": u(keys[3], (4 * H,)),
        "w_ih2": u(keys[4], (4 * H, H)),
        "w_hh2": u(keys[5], (4 * H, H)),
        "b_ih2": u(keys[6], (4 * H,)),
        "b_hh2": u(keys[7], (4 * H,)),
        "w_out": u(keys[8], (1, H)),
        "b_out": u(keys[9], (1,)),
    }


def _pad_gate_rows(w, H, HP):
    """(4H, K) -> (4*HP, K): zero-pad each of the 4 gate blocks from H to HP rows."""
    w4 = w.reshape(4, H, -1)
    w4 = jnp.pad(w4, ((0, 0), (0, HP - H), (0, 0)))
    return w4.reshape(4 * HP, -1)


def pack_params(params, hidden_size=HIDDEN_SIZE, hidden_pad=HIDDEN_PAD):
    H, HP = hidden_size, hidden_pad
    pad_cols = lambda w: jnp.pad(w, ((0, 0), (0, HP - H)))
    wih1 = _pad_gate_rows(params["w_ih1"], H, HP)                                  # (4HP, 2)
    return {
        "wih1_a": wih1[:, 0:1],                                                    # (4HP, 1)
        "wih1_b": wih1[:, 1:2],                                                    # (4HP, 1)
        "whh1": pad_cols(_pad_gate_rows(params["w_hh1"], H, HP)),                  # (4HP, HP)
        "b1": _pad_gate_rows((params["b_ih1"] + params["b_hh1"])[:, None], H, HP),  # (4HP, 1)
        "wih2": pad_cols(_pad_gate_rows(params["w_ih2"], H, HP)),                  # (4HP, HP)
        "whh2": pad_cols(_pad_gate_rows(params["w_hh2"], H, HP)),                  # (4HP, HP)
        "b2": _pad_gate_rows((params["b_ih2"] + params["b_hh2"])[:, None], H, HP),  # (4HP, 1)
        "wout": jnp.pad(params["w_out"].T, ((0, HP - H), (0, 0))),                 # (HP, 1)
        "bout": params["b_out"].reshape(1, 1),                                     # (1, 1)
    }


# ---------------- pure-JAX reference (mirrors the PyTorch forward) ----------------

def reference_forward(inp, hidden, cell, params):
    p = PREPROCESSING_FACTOR
    ax = jnp.abs(inp)
    keep = ax >= _THRESHOLD
    col0 = jnp.where(keep, jnp.log(ax + 1e-8) / p, -1.0)
    col1 = jnp.where(keep, jnp.sign(inp), _EXP_FACTOR * inp)
    x = jnp.concatenate([col0, col1], axis=1)

    def cell_fn(x, h, c, w_ih, w_hh, b_ih, b_hh):
        H = h.shape[-1]
        g = x @ w_ih.T + h @ w_hh.T + b_ih + b_hh
        i = jax.nn.sigmoid(g[:, :H])
        f = jax.nn.sigmoid(g[:, H:2 * H])
        gg = jnp.tanh(g[:, 2 * H:3 * H])
        o = jax.nn.sigmoid(g[:, 3 * H:])
        c_new = f * c + i * gg
        return o * jnp.tanh(c_new), c_new

    h0, c0 = cell_fn(x, hidden[0], cell[0],
                     params["w_ih1"], params["w_hh1"], params["b_ih1"], params["b_hh1"])
    h1, c1 = cell_fn(h0, hidden[1], cell[1],
                     params["w_ih2"], params["w_hh2"], params["b_ih2"], params["b_hh2"])
    out = h1 @ params["w_out"].T + params["b_out"]
    return out, (h0, h1), (c0, c1)


if __name__ == "__main__":
    key = jax.random.PRNGKey(0)
    k_param, k_inp, k_h0, k_h1, k_c0, k_c1 = jax.random.split(key, 6)

    H = HIDDEN_SIZE
    params = init_params(k_param)
    packed = pack_params(params)

    def make_inputs(n):
        inp = jax.random.normal(k_inp, (n, 1), jnp.float32) * 0.1
        # exercise both preprocessing branches (tiny and regular gradients)
        inp = inp.at[0, 0].set(1e-6).at[1, 0].set(-2e-6)
        hidden = (jax.random.normal(k_h0, (n, H), jnp.float32) * 0.1,
                  jax.random.normal(k_h1, (n, H), jnp.float32) * 0.1)
        cell = (jax.random.normal(k_c0, (n, H), jnp.float32) * 0.1,
                jax.random.normal(k_c1, (n, H), jnp.float32) * 0.1)
        return inp, hidden, cell

    ok = True
    # (N=8 -> single 128-wide tile) and (N=300, tile 128 -> 3-step grid w/ padding)
    for n, max_tile in ((8, 1024), (300, 128)):
        inp, hidden, cell = make_inputs(n)
        out, (h0, h1), (c0, c1) = optimizer_network_forward(
            inp, hidden, cell, packed, max_tile_n=max_tile)
        jax.block_until_ready((out, h0, h1, c0, c1))

        ref_out, (rh0, rh1), (rc0, rc1) = reference_forward(inp, hidden, cell, params)
        for a, b in ((out, ref_out), (h0, rh0), (h1, rh1), (c0, rc0), (c1, rc1)):
            ok = ok and bool(jnp.allclose(a, b, atol=2e-5, rtol=2e-5))

    assert ok, "mismatch vs reference"
    print("KERNEL_OK")
</pallas_src>

<mosaic_0001>
module attributes {stable_mosaic.version = 11 : i64} {
  func.func @optimizer_net_kernel(%arg0: i32, %arg1: memref<1x128xf32, #tpu.memory_space<vmem>>, %arg2: memref<32x128xf32, #tpu.memory_space<vmem>>, %arg3: memref<32x128xf32, #tpu.memory_space<vmem>>, %arg4: memref<32x128xf32, #tpu.memory_space<vmem>>, %arg5: memref<32x128xf32, #tpu.memory_space<vmem>>, %arg6: memref<128x1xf32, #tpu.memory_space<vmem>>, %arg7: memref<128x1xf32, #tpu.memory_space<vmem>>, %arg8: memref<128x32xf32, #tpu.memory_space<vmem>>, %arg9: memref<128x1xf32, #tpu.memory_space<vmem>>, %arg10: memref<128x32xf32, #tpu.memory_space<vmem>>, %arg11: memref<128x32xf32, #tpu.memory_space<vmem>>, %arg12: memref<128x1xf32, #tpu.memory_space<vmem>>, %arg13: memref<32x1xf32, #tpu.memory_space<vmem>>, %arg14: memref<1x1xf32, #tpu.memory_space<vmem>>, %arg15: memref<1x128xf32, #tpu.memory_space<vmem>>, %arg16: memref<32x128xf32, #tpu.memory_space<vmem>>, %arg17: memref<32x128xf32, #tpu.memory_space<vmem>>, %arg18: memref<32x128xf32, #tpu.memory_space<vmem>>, %arg19: memref<32x128xf32, #tpu.memory_space<vmem>>) attributes {dimension_semantics = [#tpu.dimension_semantics<parallel>], iteration_bounds = array<i64: 1>, scalar_prefetch = 0 : i64, scratch_operands = 0 : i64, tpu.core_type = #tpu.core_type<tc>, window_params = [{transform_indices = @transform_0, window_bounds = array<i64: 1, 128>}, {transform_indices = @transform_1, window_bounds = array<i64: 32, 128>}, {transform_indices = @transform_2, window_bounds = array<i64: 32, 128>}, {transform_indices = @transform_3, window_bounds = array<i64: 32, 128>}, {transform_indices = @transform_4, window_bounds = array<i64: 32, 128>}, {pipeline_mode = #tpu.pipeline_mode<synchronous>, transform_indices = @transform_5, window_bounds = array<i64: 128, 1>}, {pipeline_mode = #tpu.pipeline_mode<synchronous>, transform_indices = @transform_6, window_bounds = array<i64: 128, 1>}, {pipeline_mode = #tpu.pipeline_mode<synchronous>, transform_indices = @transform_7, window_bounds = array<i64: 128, 32>}, {pipeline_mode = #tpu.pipeline_mode<synchronous>, transform_indices = @transform_8, window_bounds = array<i64: 128, 1>}, {pipeline_mode = #tpu.pipeline_mode<synchronous>, transform_indices = @transform_9, window_bounds = array<i64: 128, 32>}, {pipeline_mode = #tpu.pipeline_mode<synchronous>, transform_indices = @transform_10, window_bounds = array<i64: 128, 32>}, {pipeline_mode = #tpu.pipeline_mode<synchronous>, transform_indices = @transform_11, window_bounds = array<i64: 128, 1>}, {pipeline_mode = #tpu.pipeline_mode<synchronous>, transform_indices = @transform_12, window_bounds = array<i64: 32, 1>}, {pipeline_mode = #tpu.pipeline_mode<synchronous>, transform_indices = @transform_13, window_bounds = array<i64: 1, 1>}, {transform_indices = @transform_14, window_bounds = array<i64: 1, 128>}, {transform_indices = @transform_15, window_bounds = array<i64: 32, 128>}, {transform_indices = @transform_16, window_bounds = array<i64: 32, 128>}, {transform_indices = @transform_17, window_bounds = array<i64: 32, 128>}, {transform_indices = @transform_18, window_bounds = array<i64: 32, 128>}]} {
    %c0 = arith.constant 0 : index
    %c0_0 = arith.constant 0 : index
    %0 = vector.load %arg1[%c0, %c0_0] : memref<1x128xf32, #tpu.memory_space<vmem>>, vector<1x128xf32>
    %1 = math.absf %0 : vector<1x128xf32>
    %cst = arith.constant 4.5399931E-5 : f32
    %2 = vector.broadcast %cst : f32 to vector<1x128xf32>
    %3 = arith.cmpf oge, %1, %2 : vector<1x128xf32>
    %cst_1 = arith.constant 9.99999993E-9 : f32
    %4 = vector.broadcast %cst_1 : f32 to vector<1x128xf32>
    %5 = arith.addf %1, %4 : vector<1x128xf32>
    %6 = math.log %5 : vector<1x128xf32>
    %cst_2 = arith.constant 1.000000e+01 : f32
    %7 = vector.broadcast %cst_2 : f32 to vector<1x128xf32>
    %8 = arith.divf %6, %7 : vector<1x128xf32>
    %cst_3 = arith.constant -1.000000e+00 : f32
    %9 = vector.broadcast %cst_3 : f32 to vector<1x128xf32>
    %10 = arith.select %3, %8, %9 : vector<1x128xi1>, vector<1x128xf32>
    %cst_4 = arith.constant 0.000000e+00 : f32
    %11 = vector.broadcast %cst_4 : f32 to vector<1x128xf32>
    %12 = arith.cmpf oge, %0, %11 : vector<1x128xf32>
    %cst_5 = arith.constant 1.000000e+00 : f32
    %cst_6 = arith.constant -1.000000e+00 : f32
    %13 = vector.broadcast %cst_5 : f32 to vector<1x128xf32>
    %14 = vector.broadcast %cst_6 : f32 to vector<1x128xf32>
    %15 = arith.select %12, %13, %14 : vector<1x128xi1>, vector<1x128xf32>
    %cst_7 = arith.constant 22026.4648 : f32
    %16 = vector.broadcast %cst_7 : f32 to vector<1x128xf32>
    %17 = arith.mulf %16, %0 : vector<1x128xf32>
    %18 = arith.select %3, %15, %17 : vector<1x128xi1>, vector<1x128xf32>
    %c0_8 = arith.constant 0 : index
    %c0_9 = arith.constant 0 : index
    %19 = vector.load %arg6[%c0_8, %c0_9] : memref<128x1xf32, #tpu.memory_space<vmem>>, vector<128x1xf32>
    %20 = vector.broadcast %19 : vector<128x1xf32> to vector<128x128xf32>
    %21 = vector.broadcast %10 : vector<1x128xf32> to vector<128x128xf32>
    %22 = arith.mulf %20, %21 : vector<128x128xf32>
    %c0_10 = arith.constant 0 : index
    %c0_11 = arith.constant 0 : index
    %23 = vector.load %arg7[%c0_10, %c0_11] : memref<128x1xf32, #tpu.memory_space<vmem>>, vector<128x1xf32>
    %24 = vector.broadcast %23 : vector<128x1xf32> to vector<128x128xf32>
    %25 = vector.broadcast %18 : vector<1x128xf32> to vector<128x128xf32>
    %26 = arith.mulf %24, %25 : vector<128x128xf32>
    %27 = arith.addf %22, %26 : vector<128x128xf32>
    %c0_12 = arith.constant 0 : index
    %c0_13 = arith.constant 0 : index
    %28 = vector.load %arg2[%c0_12, %c0_13] : memref<32x128xf32, #tpu.memory_space<vmem>>, vector<32x128xf32>
    %c0_14 = arith.constant 0 : index
    %c0_15 = arith.constant 0 : index
    %29 = vector.load %arg4[%c0_14, %c0_15] : memref<32x128xf32, #tpu.memory_space<vmem>>, vector<32x128xf32>
    %c0_16 = arith.constant 0 : index
    %c0_17 = arith.constant 0 : index
    %30 = vector.load %arg8[%c0_16, %c0_17] : memref<128x32xf32, #tpu.memory_space<vmem>>, vector<128x32xf32>
    %c0_18 = arith.constant 0 : index
    %c0_19 = arith.constant 0 : index
    %31 = vector.load %arg9[%c0_18, %c0_19] : memref<128x1xf32, #tpu.memory_space<vmem>>, vector<128x1xf32>
    %cst_20 = arith.constant dense<0.000000e+00> : vector<128x128xf32>
    %32 = tpu.matmul %30, %28, %cst_20 {dimension_numbers = #tpu.dot_dimension_numbers<[1], [0], [0], [1], [0, 0, 1, 1], [], []>} : vector<128x32xf32>, vector<32x128xf32>, vector<128x128xf32> -> vector<128x128xf32>
    %33 = arith.addf %27, %32 : vector<128x128xf32>
    %34 = vector.broadcast %31 : vector<128x1xf32> to vector<128x128xf32>
    %35 = arith.addf %33, %34 : vector<128x128xf32>
    %36 = vector.extract_strided_slice %35 {offsets = [0, 0], sizes = [32, 128], strides = [1, 1]} : vector<128x128xf32> to vector<32x128xf32>
    %cst_21 = arith.constant 5.000000e-01 : f32
    %37 = vector.broadcast %cst_21 : f32 to vector<32x128xf32>
    %38 = arith.mulf %37, %36 : vector<32x128xf32>
    %39 = math.tanh %38 : vector<32x128xf32>
    %cst_22 = arith.constant 5.000000e-01 : f32
    %40 = vector.broadcast %cst_22 : f32 to vector<32x128xf32>
    %41 = arith.mulf %40, %39 : vector<32x128xf32>
    %cst_23 = arith.constant 5.000000e-01 : f32
    %42 = vector.broadcast %cst_23 : f32 to vector<32x128xf32>
    %43 = arith.addf %41, %42 : vector<32x128xf32>
    %44 = vector.extract_strided_slice %35 {offsets = [32, 0], sizes = [32, 128], strides = [1, 1]} : vector<128x128xf32> to vector<32x128xf32>
    %cst_24 = arith.constant 5.000000e-01 : f32
    %45 = vector.broadcast %cst_24 : f32 to vector<32x128xf32>
    %46 = arith.mulf %45, %44 : vector<32x128xf32>
    %47 = math.tanh %46 : vector<32x128xf32>
    %cst_25 = arith.constant 5.000000e-01 : f32
    %48 = vector.broadcast %cst_25 : f32 to vector<32x128xf32>
    %49 = arith.mulf %48, %47 : vector<32x128xf32>
    %cst_26 = arith.constant 5.000000e-01 : f32
    %50 = vector.broadcast %cst_26 : f32 to vector<32x128xf32>
    %51 = arith.addf %49, %50 : vector<32x128xf32>
    %52 = vector.extract_strided_slice %35 {offsets = [64, 0], sizes = [32, 128], strides = [1, 1]} : vector<128x128xf32> to vector<32x128xf32>
    %53 = math.tanh %52 : vector<32x128xf32>
    %54 = vector.extract_strided_slice %35 {offsets = [96, 0], sizes = [32, 128], strides = [1, 1]} : vector<128x128xf32> to vector<32x128xf32>
    %cst_27 = arith.constant 5.000000e-01 : f32
    %55 = vector.broadcast %cst_27 : f32 to vector<32x128xf32>
    %56 = arith.mulf %55, %54 : vector<32x128xf32>
    %57 = math.tanh %56 : vector<32x128xf32>
    %cst_28 = arith.constant 5.000000e-01 : f32
    %58 = vector.broadcast %cst_28 : f32 to vector<32x128xf32>
    %59 = arith.mulf %58, %57 : vector<32x128xf32>
    %cst_29 = arith.constant 5.000000e-01 : f32
    %60 = vector.broadcast %cst_29 : f32 to vector<32x128xf32>
    %61 = arith.addf %59, %60 : vector<32x128xf32>
    %62 = arith.mulf %51, %29 : vector<32x128xf32>
    %63 = arith.mulf %43, %53 : vector<32x128xf32>
    %64 = arith.addf %62, %63 : vector<32x128xf32>
    %65 = math.tanh %64 : vector<32x128xf32>
    %66 = arith.mulf %61, %65 : vector<32x128xf32>
    %c0_30 = arith.constant 0 : index
    %c0_31 = arith.constant 0 : index
    %67 = vector.load %arg10[%c0_30, %c0_31] : memref<128x32xf32, #tpu.memory_space<vmem>>, vector<128x32xf32>
    %cst_32 = arith.constant dense<0.000000e+00> : vector<128x128xf32>
    %68 = tpu.matmul %67, %66, %cst_32 {dimension_numbers = #tpu.dot_dimension_numbers<[1], [0], [0], [1], [0, 0, 1, 1], [], []>} : vector<128x32xf32>, vector<32x128xf32>, vector<128x128xf32> -> vector<128x128xf32>
    %c0_33 = arith.constant 0 : index
    %c0_34 = arith.constant 0 : index
    %69 = vector.load %arg3[%c0_33, %c0_34] : memref<32x128xf32, #tpu.memory_space<vmem>>, vector<32x128xf32>
    %c0_35 = arith.constant 0 : index
    %c0_36 = arith.constant 0 : index
    %70 = vector.load %arg5[%c0_35, %c0_36] : memref<32x128xf32, #tpu.memory_space<vmem>>, vector<32x128xf32>
    %c0_37 = arith.constant 0 : index
    %c0_38 = arith.constant 0 : index
    %71 = vector.load %arg11[%c0_37, %c0_38] : memref<128x32xf32, #tpu.memory_space<vmem>>, vector<128x32xf32>
    %c0_39 = arith.constant 0 : index
    %c0_40 = arith.constant 0 : index
    %72 = vector.load %arg12[%c0_39, %c0_40] : memref<128x1xf32, #tpu.memory_space<vmem>>, vector<128x1xf32>
    %cst_41 = arith.constant dense<0.000000e+00> : vector<128x128xf32>
    %73 = tpu.matmul %71, %69, %cst_41 {dimension_numbers = #tpu.dot_dimension_numbers<[1], [0], [0], [1], [0, 0, 1, 1], [], []>} : vector<128x32xf32>, vector<32x128xf32>, vector<128x128xf32> -> vector<128x128xf32>
    %74 = arith.addf %68, %73 : vector<128x128xf32>
    %75 = vector.broadcast %72 : vector<128x1xf32> to vector<128x128xf32>
    %76 = arith.addf %74, %75 : vector<128x128xf32>
    %77 = vector.extract_strided_slice %76 {offsets = [0, 0], sizes = [32, 128], strides = [1, 1]} : vector<128x128xf32> to vector<32x128xf32>
    %cst_42 = arith.constant 5.000000e-01 : f32
    %78 = vector.broadcast %cst_42 : f32 to vector<32x128xf32>
    %79 = arith.mulf %78, %77 : vector<32x128xf32>
    %80 = math.tanh %79 : vector<32x128xf32>
    %cst_43 = arith.constant 5.000000e-01 : f32
    %81 = vector.broadcast %cst_43 : f32 to vector<32x128xf32>
    %82 = arith.mulf %81, %80 : vector<32x128xf32>
    %cst_44 = arith.constant 5.000000e-01 : f32
    %83 = vector.broadcast %cst_44 : f32 to vector<32x128xf32>
    %84 = arith.addf %82, %83 : vector<32x128xf32>
    %85 = vector.extract_strided_slice %76 {offsets = [32, 0], sizes = [32, 128], strides = [1, 1]} : vector<128x128xf32> to vector<32x128xf32>
    %cst_45 = arith.constant 5.000000e-01 : f32
    %86 = vector.broadcast %cst_45 : f32 to vector<32x128xf32>
    %87 = arith.mulf %86, %85 : vector<32x128xf32>
    %88 = math.tanh %87 : vector<32x128xf32>
    %cst_46 = arith.constant 5.000000e-01 : f32
    %89 = vector.broadcast %cst_46 : f32 to vector<32x128xf32>
    %90 = arith.mulf %89, %88 : vector<32x128xf32>
    %cst_47 = arith.constant 5.000000e-01 : f32
    %91 = vector.broadcast %cst_47 : f32 to vector<32x128xf32>
    %92 = arith.addf %90, %91 : vector<32x128xf32>
    %93 = vector.extract_strided_slice %76 {offsets = [64, 0], sizes = [32, 128], strides = [1, 1]} : vector<128x128xf32> to vector<32x128xf32>
    %94 = math.tanh %93 : vector<32x128xf32>
    %95 = vector.extract_strided_slice %76 {offsets = [96, 0], sizes = [32, 128], strides = [1, 1]} : vector<128x128xf32> to vector<32x128xf32>
    %cst_48 = arith.constant 5.000000e-01 : f32
    %96 = vector.broadcast %cst_48 : f32 to vector<32x128xf32>
    %97 = arith.mulf %96, %95 : vector<32x128xf32>
    %98 = math.tanh %97 : vector<32x128xf32>
    %cst_49 = arith.constant 5.000000e-01 : f32
    %99 = vector.broadcast %cst_49 : f32 to vector<32x128xf32>
    %100 = arith.mulf %99, %98 : vector<32x128xf32>
    %cst_50 = arith.constant 5.000000e-01 : f32
    %101 = vector.broadcast %cst_50 : f32 to vector<32x128xf32>
    %102 = arith.addf %100, %101 : vector<32x128xf32>
    %103 = arith.mulf %92, %70 : vector<32x128xf32>
    %104 = arith.mulf %84, %94 : vector<32x128xf32>
    %105 = arith.addf %103, %104 : vector<32x128xf32>
    %106 = math.tanh %105 : vector<32x128xf32>
    %107 = arith.mulf %102, %106 : vector<32x128xf32>
    %c0_51 = arith.constant 0 : index
    %c0_52 = arith.constant 0 : index
    %108 = vector.load %arg13[%c0_51, %c0_52] : memref<32x1xf32, #tpu.memory_space<vmem>>, vector<32x1xf32>
    %109 = vector.broadcast %108 : vector<32x1xf32> to vector<32x128xf32>
    %110 = arith.mulf %107, %109 : vector<32x128xf32>
    %cst_53 = arith.constant dense<0.000000e+00> : vector<128xf32>
    %111 = vector.multi_reduction <add>, %110, %cst_53 [0] : vector<32x128xf32> to vector<128xf32>
    %112 = vector.shape_cast %111 : vector<128xf32> to vector<1x128xf32>
    %c0_54 = arith.constant 0 : index
    %c0_55 = arith.constant 0 : index
    %113 = vector.load %arg14[%c0_54, %c0_55] : memref<1x1xf32, #tpu.memory_space<vmem>>, vector<1x1xf32>
    %114 = vector.broadcast %113 : vector<1x1xf32> to vector<1x128xf32>
    %115 = arith.addf %112, %114 : vector<1x128xf32>
    %c0_56 = arith.constant 0 : index
    %c0_57 = arith.constant 0 : index
    %116 = vector.load %arg15[%c0_56, %c0_57] : memref<1x128xf32, #tpu.memory_space<vmem>>, vector<1x128xf32>
    tpu.vector_store %arg15[%c0_56, %c0_57], %115 {strides = array<i32>} : memref<1x128xf32, #tpu.memory_space<vmem>>, vector<1x128xf32>,
    %c0_58 = arith.constant 0 : index
    %c0_59 = arith.constant 0 : index
    %117 = vector.load %arg16[%c0_58, %c0_59] : memref<32x128xf32, #tpu.memory_space<vmem>>, vector<32x128xf32>
    tpu.vector_store %arg16[%c0_58, %c0_59], %66 {strides = array<i32>} : memref<32x128xf32, #tpu.memory_space<vmem>>, vector<32x128xf32>,
    %c0_60 = arith.constant 0 : index
    %c0_61 = arith.constant 0 : index
    %118 = vector.load %arg17[%c0_60, %c0_61] : memref<32x128xf32, #tpu.memory_space<vmem>>, vector<32x128xf32>
    tpu.vector_store %arg17[%c0_60, %c0_61], %107 {strides = array<i32>} : memref<32x128xf32, #tpu.memory_space<vmem>>, vector<32x128xf32>,
    %c0_62 = arith.constant 0 : index
    %c0_63 = arith.constant 0 : index
    %119 = vector.load %arg18[%c0_62, %c0_63] : memref<32x128xf32, #tpu.memory_space<vmem>>, vector<32x128xf32>
    tpu.vector_store %arg18[%c0_62, %c0_63], %64 {strides = array<i32>} : memref<32x128xf32, #tpu.memory_space<vmem>>, vector<32x128xf32>,
    %c0_64 = arith.constant 0 : index
    %c0_65 = arith.constant 0 : index
    %120 = vector.load %arg19[%c0_64, %c0_65] : memref<32x128xf32, #tpu.memory_space<vmem>>, vector<32x128xf32>
    tpu.vector_store %arg19[%c0_64, %c0_65], %105 {strides = array<i32>} : memref<32x128xf32, #tpu.memory_space<vmem>>, vector<32x128xf32>,
    return
  }
  func.func @transform_0(%arg0: i32) -> (i32, i32) {
    %c0_i32 = arith.constant 0 : i32
    %c0_i32_0 = arith.constant 0 : i32
    return %c0_i32, %arg0 : i32, i32
  }
  func.func @transform_1(%arg0: i32) -> (i32, i32) {
    %c0_i32 = arith.constant 0 : i32
    %c0_i32_0 = arith.constant 0 : i32
    return %c0_i32, %arg0 : i32, i32
  }
  func.func @transform_2(%arg0: i32) -> (i32, i32) {
    %c0_i32 = arith.constant 0 : i32
    %c0_i32_0 = arith.constant 0 : i32
    return %c0_i32, %arg0 : i32, i32
  }
  func.func @transform_3(%arg0: i32) -> (i32, i32) {
    %c0_i32 = arith.constant 0 : i32
    %c0_i32_0 = arith.constant 0 : i32
    return %c0_i32, %arg0 : i32, i32
  }
  func.func @transform_4(%arg0: i32) -> (i32, i32) {
    %c0_i32 = arith.constant 0 : i32
    %c0_i32_0 = arith.constant 0 : i32
    return %c0_i32, %arg0 : i32, i32
  }
  func.func @transform_5(%arg0: i32) -> (i32, i32) {
    %c0_i32 = arith.constant 0 : i32
    %c0_i32_0 = arith.constant 0 : i32
    %c0_i32_1 = arith.constant 0 : i32
    return %c0_i32, %c0_i32_0 : i32, i32
  }
  func.func @transform_6(%arg0: i32) -> (i32, i32) {
    %c0_i32 = arith.constant 0 : i32
    %c0_i32_0 = arith.constant 0 : i32
    %c0_i32_1 = arith.constant 0 : i32
    return %c0_i32, %c0_i32_0 : i32, i32
  }
  func.func @transform_7(%arg0: i32) -> (i32, i32) {
    %c0_i32 = arith.constant 0 : i32
    %c0_i32_0 = arith.constant 0 : i32
    %c0_i32_1 = arith.constant 0 : i32
    return %c0_i32, %c0_i32_0 : i32, i32
  }
  func.func @transform_8(%arg0: i32) -> (i32, i32) {
    %c0_i32 = arith.constant 0 : i32
    %c0_i32_0 = arith.constant 0 : i32
    %c0_i32_1 = arith.constant 0 : i32
    return %c0_i32, %c0_i32_0 : i32, i32
  }
  func.func @transform_9(%arg0: i32) -> (i32, i32) {
    %c0_i32 = arith.constant 0 : i32
    %c0_i32_0 = arith.constant 0 : i32
    %c0_i32_1 = arith.constant 0 : i32
    return %c0_i32, %c0_i32_0 : i32, i32
  }
  func.func @transform_10(%arg0: i32) -> (i32, i32) {
    %c0_i32 = arith.constant 0 : i32
    %c0_i32_0 = arith.constant 0 : i32
    %c0_i32_1 = arith.constant 0 : i32
    return %c0_i32, %c0_i32_0 : i32, i32
  }
  func.func @transform_11(%arg0: i32) -> (i32, i32) {
    %c0_i32 = arith.constant 0 : i32
    %c0_i32_0 = arith.constant 0 : i32
    %c0_i32_1 = arith.constant 0 : i32
    return %c0_i32, %c0_i32_0 : i32, i32
  }
  func.func @transform_12(%arg0: i32) -> (i32, i32) {
    %c0_i32 = arith.constant 0 : i32
    %c0_i32_0 = arith.constant 0 : i32
    %c0_i32_1 = arith.constant 0 : i32
    return %c0_i32, %c0_i32_0 : i32, i32
  }
  func.func @transform_13(%arg0: i32) -> (i32, i32) {
    %c0_i32 = arith.constant 0 : i32
    %c0_i32_0 = arith.constant 0 : i32
    %c0_i32_1 = arith.constant 0 : i32
    return %c0_i32, %c0_i32_0 : i32, i32
  }
  func.func @transform_14(%arg0: i32) -> (i32, i32) {
    %c0_i32 = arith.constant 0 : i32
    %c0_i32_0 = arith.constant 0 : i32
    return %c0_i32, %arg0 : i32, i32
  }
  func.func @transform_15(%arg0: i32) -> (i32, i32) {
    %c0_i32 = arith.constant 0 : i32
    %c0_i32_0 = arith.constant 0 : i32
    return %c0_i32, %arg0 : i32, i32
  }
  func.func @transform_16(%arg0: i32) -> (i32, i32) {
    %c0_i32 = arith.constant 0 : i32
    %c0_i32_0 = arith.constant 0 : i32
    return %c0_i32, %arg0 : i32, i32
  }
  func.func @transform_17(%arg0: i32) -> (i32, i32) {
    %c0_i32 = arith.constant 0 : i32
    %c0_i32_0 = arith.constant 0 : i32
    return %c0_i32, %arg0 : i32, i32
  }
  func.func @transform_18(%arg0: i32) -> (i32, i32) {
    %c0_i32 = arith.constant 0 : i32
    %c0_i32_0 = arith.constant 0 : i32
    return %c0_i32, %arg0 : i32, i32
  }
}

</mosaic_0001>

<bundles_post_ra>
// kernel: _forward_padded.1
= control target key start
LH: loop header
LB: loop body
LE: loop exit
PB: predicated region body
PF: predicated region fallthrough
CT: control target
= control target key end

     0   :  { %v1339_v0 = vmov 0   ;;  %vm359_vm0 = vcmask 261120   ;;  %v1340_v55 = vmov 10.0   ;;  %s2089_s5 = inlined_call_operand.vmem [shape: f32[128,1], index: 5, kind: input, shape index: {}]   ;;  %s2090_s1 = inlined_call_operand.vmem [shape: f32[32,128], index: 1, kind: input, shape index: {}, may-alias: {1,15}]   ;;  %s2091_s7 = inlined_call_operand.vmem [shape: f32[128,32], index: 7, kind: input, shape index: {}]   ;;  %s2092_s6 = inlined_call_operand.vmem [shape: f32[128,1], index: 6, kind: input, shape index: {}]   ;;  %s2093_s8 = inlined_call_operand.vmem [shape: f32[128,1], index: 8, kind: input, shape index: {}]   ;;  %s2094_s0 = inlined_call_operand.vmem [shape: f32[1,128], index: 0, kind: input, shape index: {}]   ;;  %s2095_s11 = inlined_call_operand.vmem [shape: f32[128,1], index: 11, kind: input, shape index: {}]   ;;  %s2096_s13 = inlined_call_operand.<no memory space> [shape: f32[1,1], index: 13, kind: input, shape index: {}]   ;;  %s2097_s12 = inlined_call_operand.vmem [shape: f32[32,1], index: 12, kind: input, shape index: {}]   ;;  %s2098_s2 = inlined_call_operand.vmem [shape: f32[32,128], index: 2, kind: input, shape index: {}, may-alias: {2,16}]   ;;  %s2099_s10 = inlined_call_operand.vmem [shape: f32[128,32], index: 10, kind: input, shape index: {}]   ;;  %s2100_s3 = inlined_call_operand.vmem [shape: f32[32,128], index: 3, kind: input, shape index: {}, may-alias: {3,17}]   ;;  %s2101_s17 = inlined_call_operand.vmem [shape: f32[32,128], index: 17, kind: output, shape index: {3}, may-alias: {3,17}]   ;;  %s2102_s15 = inlined_call_operand.vmem [shape: f32[32,128], index: 15, kind: output, shape index: {1}, may-alias: {1,15}]   ;;  %s2103_s9 = inlined_call_operand.vmem [shape: f32[128,32], index: 9, kind: input, shape index: {}]   ;;  %s2104_s4 = inlined_call_operand.vmem [shape: f32[32,128], index: 4, kind: input, shape index: {}, may-alias: {4,18}]   ;;  %s2105_s18 = inlined_call_operand.vmem [shape: f32[32,128], index: 18, kind: output, shape index: {4}, may-alias: {4,18}]   ;;  %s2106_s16 = inlined_call_operand.vmem [shape: f32[32,128], index: 16, kind: output, shape index: {2}, may-alias: {2,16}]   ;;  %s2107_s14 = inlined_call_operand.vmem [shape: f32[1,128], index: 14, kind: output, shape index: {0}]  }
   0x1   :  { %2111 = sst [smem:[#allocation3_spill]] %s2089_s5  ;;  %1254 = vset.pattern.permute.xlu2 %v1339_v0  ;;  %1253 = vset.pattern.permute.xlu1 %v1339_v0  ;;  %v190_v23 = vld [vmem:[%s2092_s6 + $0x10] sm:$0xff]  ;;  %v195_v25 = vld [vmem:[%s2092_s6 + $0x38] sm:$0xff]  ;;  %v193_v28 = vld [vmem:[%s2092_s6 + $0x28] sm:$0xff]  ;;  %1255 = vrcp.f32 %v1340_v55 }
   0x2   :  { %2112 = sst [smem:[#allocation4_spill]] %s2090_s1  ;;  %1252 = vset.pattern.permute.xlu0 %v1339_v0  ;;  %v191_v26 = vld [vmem:[%s2092_s6 + $0x18] sm:$0xff]  ;;  %v189_v30 = vld [vmem:[%s2092_s6 + $0x8] sm:$0xff]  ;;  %v194_v31 = vld [vmem:[%s2092_s6 + $0x30] sm:$0xff] }
   0x3   :  { %2113 = sst [smem:[#allocation5_spill]] %s2091_s7  ;;  %v199_v32 = vld [vmem:[%s2092_s6 + $0x58] sm:$0xff]  ;;  %v192_v34 = vld [vmem:[%s2092_s6 + $0x20] sm:$0xff]  ;;  %v198_v36 = vld [vmem:[%s2092_s6 + $0x50] sm:$0xff] }
   0x4   :  { %s2114_s29 = sld [smem:[#allocation3_spill]]  ;;  %v188_v35 = vld [vmem:[%s2092_s6] sm:$0xff]  ;;  %v350_v38 = vld [vmem:[%s2093_s8 + $0x38] sm:$0xff]  ;;  %v197_v40 = vld [vmem:[%s2092_s6 + $0x48] sm:$0xff] }
   0x5   :  { %s2115_s22 = sld [smem:[#allocation4_spill]]  ;;  %v346_v39 = vld [vmem:[%s2093_s8 + $0x18] sm:$0xff]  ;;  %v349_v42 = vld [vmem:[%s2093_s8 + $0x30] sm:$0xff]  ;;  %v348_v46 = vld [vmem:[%s2093_s8 + $0x28] sm:$0xff] }
   0x6   :  { %s2116_s1 = sld [smem:[#allocation5_spill]]  ;;  %v345_v43 = vld [vmem:[%s2093_s8 + $0x10] sm:$0xff]  ;;  %v344_v47 = vld [vmem:[%s2093_s8 + $0x8] sm:$0xff]  ;;  %v343_v48 = vld [vmem:[%s2093_s8] sm:$0xff] }
   0x7   :  { %v196_v50 = vld [vmem:[%s2092_s6 + $0x40] sm:$0xff]  ;;  %v203_v51 = vld [vmem:[%s2092_s6 + $0x78] sm:$0xff]  ;;  %v1256_v59 = vpop.eup %1255  ;;  %v353_v63 = vld [vmem:[%s2093_s8 + $0x50] sm:$0xff] }
   0x8   :  { %v354_v54 = vld [vmem:[%s2093_s8 + $0x58] sm:$0xff]  ;;  %v347_v56 = vld [vmem:[%s2093_s8 + $0x20] sm:$0xff]  ;;  %v61_v0 = vmul.f32 10.0, %v1256_v59  ;;  %vm65_vm1 = vweird.f32 %v1256_v59 }
   0x9   :  { %v54_v58 = vld [vmem:[%s2094_s0] sm:$0x1] }
   0xa   :  { %v77_v1 = vld [vmem:[%s2114_s29 + $0x20] sm:$0xff]  ;;  %v75_v2 = vld [vmem:[%s2114_s29 + $0x10] sm:$0xff]  ;;  %v78_v8 = vld [vmem:[%s2114_s29 + $0x28] sm:$0xff]  ;;  %v55_v60 = vand.u32 2147483647, %v54_v58  ;;  %vm69_vm2 = vcmp.ge.f32.partialorder %v54_v58, 0.0 }
   0xb   :  { %v73_v3 = vld [vmem:[%s2114_s29] sm:$0xff]  ;;  %111 = vperm.xlu2 %1254, %v77_v1   ;;  %v322_v4 = vld [vmem:[%s2115_s22 + $0x18] sm:$0xff]  ;;  %101 = vperm.xlu1 %1253, %v75_v2   ;;  %v321_v5 = vld [vmem:[%s2115_s22 + $0x10] sm:$0xff] }
   0xc   :  { %91 = vperm.xlu0 %1252, %v73_v3   ;;  %420 = vmatpush.msra.mxu0 %v322_v4  ;;  %v320_v6 = vld [vmem:[%s2115_s22 + $0x8] sm:$0xff]  ;;  %v319_v7 = vld [vmem:[%s2115_s22] sm:$0xff]  ;;  %v76_v10 = vld [vmem:[%s2114_s29 + $0x18] sm:$0xff]  ;;  %v57_v2 = vadd.f32 1e-08, %v55_v60 }
   0xd   :  { %1237 = vmatpush.msra.mxu3 %v322_v4  ;;  %v327_v9 = vld [vmem:[%s2116_s1] sm:$0xff]  ;;  %v74_v11 = vld [vmem:[%s2114_s29 + $0x8] sm:$0xff]  ;;  %v80_v15 = vld [vmem:[%s2114_s29 + $0x38] sm:$0xff]  ;;  %v62_v4 = vsub.f32 1.0, %v61_v0  ;;  %vm56_vm3 = vcmp.ge.f32.partialorder %v55_v60, 4.539993e-05 }
   0xe   :  { %421 = vmatpush.msra.mxu0 %v321_v5  ;;  %v339_v12 = vld [vmem:[%s2116_s1 + $0x60] sm:$0xff]  ;;  %v328_v14 = vld [vmem:[%s2116_s1 + $0x8] sm:$0xff]  ;;  %v79_v16 = vld [vmem:[%s2114_s29 + $0x30] sm:$0xff]  ;;  %1257 = vlog2.f32 %v57_v2 }
   0xf   :  { %1238 = vmatpush.msra.mxu3 %v321_v5  ;;  %v81_v13 = vld [vmem:[%s2114_s29 + $0x40] sm:$0xff]  ;;  %v340_v17 = vld [vmem:[%s2116_s1 + $0x68] sm:$0xff]  ;;  %v84_v18 = vld [vmem:[%s2114_s29 + $0x58] sm:$0xff] }
  0x10   :  { %422 = vmatpush.msra.mxu0 %v320_v6  ;;  %v329_v19 = vld [vmem:[%s2116_s1 + $0x10] sm:$0xff]  ;;  %v82_v21 = vld [vmem:[%s2114_s29 + $0x48] sm:$0xff]  ;;  %v330_v24 = vld [vmem:[%s2116_s1 + $0x18] sm:$0xff] }
  0x11   :  { %1239 = vmatpush.msra.mxu3 %v320_v6  ;;  %v83_v20 = vld [vmem:[%s2114_s29 + $0x50] sm:$0xff]  ;;  %v342_v27 = vld [vmem:[%s2116_s1 + $0x78] sm:$0xff]  ;;  %v331_v29 = vld [vmem:[%s2116_s1 + $0x20] sm:$0xff] }
  0x12   :  { %423 = vmatpush.msra.mxu0 %v319_v7  ;;  %v341_v22 = vld [vmem:[%s2116_s1 + $0x70] sm:$0xff]  ;;  %v332_v33 = vld [vmem:[%s2116_s1 + $0x28] sm:$0xff]  ;;  %v334_v41 = vld [vmem:[%s2116_s1 + $0x38] sm:$0xff] }
  0x13   :  { %116 = vperm.xlu2 %1254, %v78_v8   ;;  %1189 = vmatmul.msk.f32.vlgmr.msra.gmra.mxu0 %vm359_vm0, %v327_v9  ;;  %v333_v37 = vld [vmem:[%s2116_s1 + $0x30] sm:$0xff]  ;;  %v88_v44 = vld [vmem:[%s2114_s29 + $0x78] sm:$0xff]  ;;  %v335_v45 = vld [vmem:[%s2116_s1 + $0x40] sm:$0xff] }
  0x14   :  { %106 = vperm.xlu1 %1253, %v76_v10   ;;  %96 = vperm.xlu0 %1252, %v74_v11   ;;  %v336_v49 = vld [vmem:[%s2116_s1 + $0x48] sm:$0xff]  ;;  %v87_v52 = vld [vmem:[%s2114_s29 + $0x70] sm:$0xff]  ;;  %v338_v62 = vld [vmem:[%s2116_s1 + $0x58] sm:$0xff]  ;;  %v1258_v10 = vpop.eup %1257 }
  0x15   :  { %1240 = vmatpush.msra.mxu3 %v319_v7  ;;  %v337_v53 = vld [vmem:[%s2116_s1 + $0x50] sm:$0xff]  ;;  %v86_v61 = vld [vmem:[%s2114_s29 + $0x68] sm:$0xff]  ;;  %v85_v5 = vld [vmem:[%s2114_s29 + $0x60] sm:$0xff]  ;;  %v63_v7 = vmul.f32 %v1256_v59, %v62_v4 }
  0x16   :  { %1201 = vmatmul.msk.f32.vlgmr.msra.gmra.mxu3 %vm359_vm0, %v339_v12  ;;  %v202_v1 = vld [vmem:[%s2092_s6 + $0x70] sm:$0xff]  ;;  %v352_v6 = vld [vmem:[%s2093_s8 + $0x48] sm:$0xff]  ;;  %v351_v12 = vld [vmem:[%s2093_s8 + $0x40] sm:$0xff] }
  0x17   :  { %v201_v8 = vld [vmem:[%s2092_s6 + $0x68] sm:$0xff]  ;;  %v64_v11 = vadd.f32 %v1256_v59, %v63_v7  ;;  %v704_v60 = vld [vmem:[%s2095_s11 + $0x38] sm:$0xff]  ;;  %v707_v7 = vld [vmem:[%s2095_s11 + $0x50] sm:$0xff] }
  0x1b   :  { %131 = vperm.xlu2 %1254, %v81_v13   ;;  %1190 = vmatmul.msk.f32.gmra.mxu0 %vm359_vm0, %v328_v14  ;;  %v59_v13 = vmul.f32 0.6931472, %v1258_v10  ;;  %v358_v14 = vld [vmem:[%s2093_s8 + $0x78] sm:$0xff]  ;;  %v706_v10 = vld [vmem:[%s2095_s11 + $0x48] sm:$0xff] }
  0x1c   :  { %126 = vperm.xlu1 %1253, %v80_v15   ;;  %121 = vperm.xlu0 %1252, %v79_v16   ;;  %v66_v15 = vsel %vm65_vm1, %v1256_v59, %v64_v11  ;;  %v200_v16 = vld [vmem:[%s2092_s6 + $0x60] sm:$0xff] }
  0x1e   :  { %1202 = vmatmul.msk.f32.gmra.mxu3 %vm359_vm0, %v340_v17  ;;  %v71_v17 = vmul.f32 22026.465, %v54_v58 }
  0x23   :  { %146 = vperm.xlu2 %1254, %v84_v18   ;;  %1191 = vmatmul.msk.f32.gmra.mxu0 %vm359_vm0, %v329_v19  ;;  %v1341_v18 = vmov -1.0  }
  0x24   :  { %141 = vperm.xlu1 %1253, %v83_v20   ;;  %136 = vperm.xlu0 %1252, %v82_v21   ;;  %v70_v19 = vsel %vm69_vm2, 1.0, %v1341_v18  ;;  %v67_v20 = vmul.f32 %v66_v15, %v59_v13 }
  0x26   :  { %1203 = vmatmul.msk.f32.gmra.mxu3 %vm359_vm0, %v341_v22 }
  0x2b   :  { %216 = vperm.xlu2 %1254, %v190_v23   ;;  %1192 = vmatmul.msk.f32.gmra.mxu0 %vm359_vm0, %v330_v24  ;;  %v72_v24 = vsel %vm56_vm3, %v70_v19, %v71_v17  ;;  %v711_v17 = vld [vmem:[%s2095_s11 + $0x70] sm:$0xff] }
  0x2c   :  { %241 = vperm.xlu1 %1253, %v195_v25   ;;  %221 = vperm.xlu0 %1252, %v191_v26   ;;  %v355_v25 = vld [vmem:[%s2093_s8 + $0x60] sm:$0xff]  ;;  %v68_v26 = vsel %vm56_vm3, %v67_v20, -1.0  ;;  %v710_v20 = vld [vmem:[%s2095_s11 + $0x68] sm:$0xff] }
  0x2e   :  { %1204 = vmatmul.msk.f32.gmra.mxu3 %vm359_vm0, %v342_v27  ;;  %v356_v27 = vld [vmem:[%s2093_s8 + $0x68] sm:$0xff] }
  0x33   :  { %231 = vperm.xlu2 %1254, %v193_v28   ;;  %1193 = vmatmul.msk.f32.gmra.mxu0 %vm359_vm0, %v331_v29  ;;  %v357_v28 = vld [vmem:[%s2093_s8 + $0x70] sm:$0xff]  ;;  %v1666_v29 = vperm.slane %v72_v24, 0 }
  0x34   :  { %211 = vperm.xlu1 %1253, %v189_v30   ;;  %236 = vperm.xlu0 %1252, %v194_v31   ;;  %v1668_v30 = vperm.slane %v68_v26, 0 }
  0x3b   :  { %261 = vperm.xlu2 %1254, %v199_v32   ;;  %1194 = vmatmul.msk.f32.gmra.mxu0 %vm359_vm0, %v332_v33 }
  0x3c   :  { %226 = vperm.xlu1 %1253, %v192_v34   ;;  %206 = vperm.xlu0 %1252, %v188_v35  }
  0x43   :  { %256 = vperm.xlu2 %1254, %v198_v36   ;;  %1195 = vmatmul.msk.f32.gmra.mxu0 %vm359_vm0, %v333_v37  ;;  %v699_v36 = vld [vmem:[%s2095_s11 + $0x10] sm:$0xff] }
  0x44   :  { %526 = vperm.xlu1 %1253, %v350_v38   ;;  %506 = vperm.xlu0 %1252, %v346_v39   ;;  %v698_v38 = vld [vmem:[%s2095_s11 + $0x8] sm:$0xff]  ;;  %v697_v39 = vld [vmem:[%s2095_s11] sm:$0xff] }
  0x4b   :  { %251 = vperm.xlu2 %1254, %v197_v40   ;;  %1196 = vmatmul.msk.f32.gmra.mxu0 %vm359_vm0, %v334_v41 }
  0x4c   :  { %521 = vperm.xlu1 %1253, %v349_v42   ;;  %501 = vperm.xlu0 %1252, %v345_v43  }
  0x53   :  { %166 = vperm.xlu2 %1254, %v88_v44   ;;  %1197 = vmatmul.msk.f32.gmra.mxu0 %vm359_vm0, %v335_v45  ;;  %v702_v45 = vld [vmem:[%s2095_s11 + $0x28] sm:$0xff] }
  0x54   :  { %516 = vperm.xlu1 %1253, %v348_v46   ;;  %496 = vperm.xlu0 %1252, %v344_v47  }
  0x5b   :  { %491 = vperm.xlu2 %1254, %v343_v48   ;;  %1198 = vmatmul.msk.f32.gmra.mxu0 %vm359_vm0, %v336_v49  ;;  %v701_v48 = vld [vmem:[%s2095_s11 + $0x20] sm:$0xff]  ;;  %v700_v49 = vld [vmem:[%s2095_s11 + $0x18] sm:$0xff] }
  0x5c   :  { %246 = vperm.xlu1 %1253, %v196_v50   ;;  %281 = vperm.xlu0 %1252, %v203_v51   ;;  %v24_v50 = vstv %s2096_s13 }
  0x5d   :  { %25 = vst [vmem:[#allocation2] sm:$0x1] %v24_v50 }
  0x63   :  { %161 = vperm.xlu2 %1254, %v87_v52   ;;  %1199 = vmatmul.msk.f32.gmra.mxu0 %vm359_vm0, %v337_v53 }
  0x64   :  { %546 = vperm.xlu1 %1253, %v354_v54   ;;  %511 = vperm.xlu0 %1252, %v347_v56   ;;  %v705_v56 = vld [vmem:[%s2095_s11 + $0x40] sm:$0xff] }
  0x65   :  { %v1617_v57 = vpop.permute.xlu2 %111 }
  0x6b   :  { %156 = vperm.xlu2 %1254, %v86_v61   ;;  %1200 = vmatmul.msk.f32.gmra.mxu0 %vm359_vm0, %v338_v62  ;;  %v703_v61 = vld [vmem:[%s2095_s11 + $0x30] sm:$0xff] }
  0x6c   :  { %541 = vperm.xlu1 %1253, %v353_v63   ;;  %276 = vperm.xlu0 %1252, %v202_v1  }
  0x6d   :  { %v117_v3 = vpop.permute.xlu2 %116 }
  0x6e   :  { %v177_v41 = vmul.f32 %v1668_v30, %v117_v3 }
  0x73   :  { %151 = vperm.xlu2 %1254, %v85_v5   ;;  %v708_v5 = vld [vmem:[%s2095_s11 + $0x58] sm:$0xff] }
  0x74   :  { %536 = vperm.xlu1 %1253, %v352_v6   ;;  %271 = vperm.xlu0 %1252, %v201_v8  }
  0x75   :  { %v1644_v9 = vpop.permute.xlu2 %131 }
  0x7b   :  { %531 = vperm.xlu2 %1254, %v351_v12  }
  0x7c   :  { %566 = vperm.xlu1 %1253, %v358_v14   ;;  %266 = vperm.xlu0 %1252, %v200_v16  }
  0x7d   :  { %v147_v21 = vpop.permute.xlu2 %146  ;;  %v102_v22 = vpop.permute.xlu1 %101 }
  0x7e   :  { %v1655_v23 = vpop.permute.xlu0 %91  ;;  %v174_v32 = vmul.f32 %v1668_v30, %v102_v22  ;;  %v183_v52 = vmul.f32 %v1668_v30, %v147_v21  ;;  %v709_v21 = vld [vmem:[%s2095_s11 + $0x60] sm:$0xff] }
  0x83   :  { %551 = vperm.xlu2 %1254, %v355_v25  }
  0x84   :  { %556 = vperm.xlu1 %1253, %v356_v27   ;;  %561 = vperm.xlu0 %1252, %v357_v28   ;;  %v172_v27 = vmul.f32 %v1668_v30, %v1655_v23 }
  0x85   :  { %v217_v31 = vpop.permute.xlu2 %216 }
  0x86   :  { %v289_v33 = vmul.f32 %v1666_v29, %v217_v31  ;;  %v107_v34 = vpop.permute.xlu1 %106  ;;  %v97_v35 = vpop.permute.xlu0 %96  ;;  %v1108_v31 = vld [vmem:[%s2097_s12 + $0x8] sm:$0xff] }
  0x87   :  { %v175_v3 = vmul.f32 %v1668_v30, %v107_v34  ;;  %v173_v14 = vmul.f32 %v1668_v30, %v97_v35  ;;  %v712_v35 = vld [vmem:[%s2095_s11 + $0x78] sm:$0xff] }
  0x88   :  { %v1675_v37 = vadd.f32 %v289_v33, %v174_v32  ;;  %v1107_v33 = vld [vmem:[%s2097_s12] sm:$0xff] }
  0x8b   :  { %951 = vperm.xlu2 %1254, %v699_v36  }
  0x8c   :  { %946 = vperm.xlu1 %1253, %v698_v38   ;;  %941 = vperm.xlu0 %1252, %v697_v39  }
  0x8d   :  { %v232_v40 = vpop.permute.xlu2 %231 }
  0x8e   :  { %v292_v42 = vmul.f32 %v1666_v29, %v232_v40  ;;  %v127_v43 = vpop.permute.xlu1 %126  ;;  %v1685_v44 = vpop.permute.xlu0 %121  ;;  %v1144_v40 = vld [vmem:[#allocation2] sm:$0x1] }
  0x8f   :  { %v179_v0 = vmul.f32 %v1668_v30, %v127_v43  ;;  %v1109_v43 = vld [vmem:[%s2097_s12 + $0x10] sm:$0xff] }
  0x90   :  { %v1690_v46 = vadd.f32 %v292_v42, %v177_v41  ;;  %v1692_v47 = vpop.f32.mrf.mxu0  ;;  %v1110_v42 = vld [vmem:[%s2097_s12 + $0x18] sm:$0xff] }
  0x93   :  { %966 = vperm.xlu2 %1254, %v702_v45  }
  0x94   :  { %961 = vperm.xlu1 %1253, %v701_v48   ;;  %956 = vperm.xlu0 %1252, %v700_v49  }
  0x95   :  { %v262_v51 = vpop.permute.xlu2 %261 }
  0x96   :  { %v298_v53 = vmul.f32 %v1666_v29, %v262_v51  ;;  %v1705_v54 = vpop.permute.xlu1 %141  ;;  %v1707_v55 = vpop.permute.xlu0 %136 }
  0x98   :  { %v1712_v58 = vadd.f32 %v298_v53, %v183_v52  ;;  %v428_v59 = vpop.f32.mrf.mxu0  ;;  %v676_v52 = vld [vmem:[%s2098_s2 + $0x18] sm:$0xff] }
  0x99   :  { %1241 = vmatpush.msrb.mxu3 %v676_v52  ;;  %773 = vmatpush.msra.mxu1 %v676_v52 }
  0x9b   :  { %981 = vperm.xlu2 %1254, %v705_v56  }
  0x9c   :  { %976 = vperm.xlu1 %1253, %v704_v60   ;;  %971 = vperm.xlu0 %1252, %v703_v61  }
  0x9d   :  { %v1720_v62 = vpop.permute.xlu2 %256 }
  0x9e   :  { %v242_v63 = vpop.permute.xlu1 %241  ;;  %v222_v2 = vpop.permute.xlu0 %221 }
  0x9f   :  { %v294_v1 = vmul.f32 %v1666_v29, %v242_v63  ;;  %v290_v4 = vmul.f32 %v1666_v29, %v222_v2  ;;  %v674_v63 = vld [vmem:[%s2098_s2 + $0x8] sm:$0xff]  ;;  %v1801_v2 = vpop.f32.mrf.mxu3 }
  0xa0   :  { %v1729_v6 = vpop.f32.mrf.mxu0 }
  0xa1   :  { %v1734_v8 = vadd.f32 %v294_v1, %v179_v0  ;;  %v1739_v11 = vadd.f32 %v290_v4, %v175_v3  ;;  %v178_v0 = vmul.f32 %v1668_v30, %v1685_v44  ;;  %v673_v3 = vld [vmem:[%s2098_s2] sm:$0xff] }
  0xa3   :  { %996 = vperm.xlu2 %1254, %v708_v5  }
  0xa4   :  { %991 = vperm.xlu1 %1253, %v707_v7   ;;  %986 = vperm.xlu0 %1252, %v706_v10   ;;  %v693_v7 = vld [vmem:[%s2099_s10 + $0x60] sm:$0xff] }
  0xa5   :  { %v1741_v12 = vpop.permute.xlu2 %251 }
  0xa6   :  { %v212_v13 = vpop.permute.xlu1 %211  ;;  %v237_v16 = vpop.permute.xlu0 %236 }
  0xa7   :  { %v288_v15 = vmul.f32 %v1666_v29, %v212_v13  ;;  %v293_v60 = vmul.f32 %v1666_v29, %v237_v16  ;;  %v180_v13 = vmul.f32 %v1668_v30, %v1644_v9 }
  0xa8   :  { %v1748_v19 = vpop.f32.mrf.mxu0 }
  0xa9   :  { %v304_v18 = vadd.f32 %v288_v15, %v173_v14  ;;  %v309_v4 = vadd.f32 %v293_v60, %v178_v0 }
  0xab   :  { %1011 = vperm.xlu2 %1254, %v711_v17   ;;  %v1756_v22 = vadd.f32 %v428_v59, %v304_v18  ;;  %v675_v59 = vld [vmem:[%s2098_s2 + $0x10] sm:$0xff]  ;;  %v176_v17 = vmul.f32 %v1668_v30, %v1617_v57 }
  0xac   :  { %1006 = vperm.xlu1 %1253, %v710_v20   ;;  %1001 = vperm.xlu0 %1252, %v709_v21  }
  0xad   :  { %v1758_v24 = vpop.permute.xlu2 %166  ;;  %1242 = vmatpush.msrb.mxu3 %v675_v59  ;;  %774 = vmatpush.msra.mxu1 %v675_v59 }
  0xae   :  { %v227_v25 = vpop.permute.xlu1 %226  ;;  %v207_v26 = vpop.permute.xlu0 %206 }
  0xaf   :  { %v287_v28 = vmul.f32 %v1666_v29, %v207_v26  ;;  %1243 = vmatpush.msrb.mxu3 %v674_v63  ;;  %775 = vmatpush.msra.mxu1 %v674_v63  ;;  %v291_v44 = vmul.f32 %v1666_v29, %v227_v25  ;;  %v475_v25 = vadd.f32 %v1729_v6, %v1675_v37 }
  0xb0   :  { %v1766_v32 = vpop.f32.mrf.mxu0 }
  0xb1   :  { %v303_v34 = vadd.f32 %v287_v28, %v172_v27  ;;  %1244 = vmatpush.msrb.mxu3 %v673_v3  ;;  %776 = vmatpush.msra.mxu1 %v673_v3  ;;  %v307_v21 = vadd.f32 %v291_v44, %v176_v17  ;;  %v181_v3 = vmul.f32 %v1668_v30, %v1707_v55 }
  0xb2   :  { %1217 = vmatmul.msk.f32.vlgmr.msrb.gmra.mxu3 %vm359_vm0, %v693_v7 }
  0xb3   :  { %1118 = vperm.xlu2 %1254, %v1108_v31   ;;  %v473_v23 = vadd.f32 %v1692_v47, %v303_v34  ;;  %v694_v31 = vld [vmem:[%s2099_s10 + $0x68] sm:$0xff]  ;;  %v477_v34 = vadd.f32 %v1766_v32, %v307_v21 }
  0xb4   :  { %1113 = vperm.xlu1 %1253, %v1107_v33   ;;  %1016 = vperm.xlu0 %1252, %v712_v35   ;;  %v1827_v35 = vpop.f32.mrf.mxu3 }
  0xb5   :  { %v492_v36 = vpop.permute.xlu2 %491 }
  0xb6   :  { %v1775_v38 = vpop.permute.xlu1 %526  ;;  %v1777_v39 = vpop.permute.xlu0 %506  ;;  %v569_v56 = vadd.f32 %v492_v36, %v473_v23 }
  0xb8   :  { %v440_v41 = vpop.f32.mrf.mxu0  ;;  %v585_v1 = vmul.f32 0.5, %v569_v56  ;;  %v297_v56 = vmul.f32 %v1666_v29, %v1720_v62  ;;  %v296_v62 = vmul.f32 %v1666_v29, %v1741_v12 }
  0xb9   :  { %v478_v28 = vadd.f32 %v440_v41, %v1690_v46 }
  0xba   :  { %1259 = vtanh.f32 %v585_v1  ;;  %1218 = vmatmul.msk.f32.gmra.mxu3 %vm359_vm0, %v694_v31 }
  0xbb   :  { %1147 = vperm.xlu2 %1254, %v1144_v40  }
  0xbc   :  { %1128 = vperm.xlu1 %1253, %v1110_v42   ;;  %1123 = vperm.xlu0 %1252, %v1109_v43   ;;  %v1848_v63 = vpop.f32.mrf.mxu3 }
  0xbd   :  { %v1785_v45 = vpop.permute.xlu2 %161 }
  0xbe   :  { %v522_v47 = vpop.permute.xlu1 %521  ;;  %v502_v48 = vpop.permute.xlu0 %501 }
  0xbf   :  { %v571_v57 = vadd.f32 %v502_v48, %v475_v25 }
  0xc0   :  { %v443_v49 = vpop.f32.mrf.mxu0  ;;  %v1260_v33 = vpop.eup %1259 }
  0xc1   :  { %v479_v14 = vadd.f32 %v443_v49, %v309_v4  ;;  %v593_v42 = vmul.f32 0.5, %v1260_v33  ;;  %v587_v32 = vmul.f32 0.5, %v571_v57  ;;  %v476_v49 = vadd.f32 %v1748_v19, %v1739_v11 }
  0xc2   :  { %v182_v11 = vmul.f32 %v1668_v30, %v1705_v54 }
  0xc3   :  { %v575_v26 = vadd.f32 %v522_v47, %v479_v14  ;;  %v572_v59 = vadd.f32 %v1777_v39, %v476_v49 }
  0xc4   :  { %v313_v0 = vadd.f32 %v297_v56, %v182_v11 }
  0xc5   :  { %v1787_v50 = vpop.permute.xlu2 %156  ;;  %v603_v37 = vmul.f32 0.5, %v575_v26  ;;  %v588_v4 = vmul.f32 0.5, %v572_v59  ;;  %v696_v26 = vld [vmem:[%s2099_s10 + $0x78] sm:$0xff] }
  0xc6   :  { %v517_v51 = vpop.permute.xlu1 %516  ;;  %v497_v53 = vpop.permute.xlu0 %496 }
  0xc7   :  { %v574_v6 = vadd.f32 %v517_v51, %v478_v28  ;;  %v570_v43 = vadd.f32 %v497_v53, %v1756_v22  ;;  %v695_v22 = vld [vmem:[%s2099_s10 + $0x70] sm:$0xff]  ;;  %v187_v28 = vmul.f32 %v1668_v30, %v1758_v24 }
  0xc8   :  { %v446_v61 = vpop.f32.mrf.mxu0  ;;  %1219 = vmatmul.msk.f32.gmra.mxu3 %vm359_vm0, %v695_v22 }
  0xc9   :  { %v480_v46 = vadd.f32 %v446_v61, %v1734_v8  ;;  %v602_v52 = vmul.f32 0.5, %v574_v6  ;;  %v597_v8 = vadd.f32 0.5, %v593_v42  ;;  %v586_v60 = vmul.f32 0.5, %v570_v43  ;;  %v470_v42 = vpop.f32.mrf.mxu3 }
  0xcb   :  { %v576_v51 = vadd.f32 %v1775_v38, %v480_v46 }
  0xcd   :  { %v1806_v5 = vpop.permute.xlu2 %151  ;;  %v604_v39 = vmul.f32 0.5, %v576_v51 }
  0xce   :  { %v247_v10 = vpop.permute.xlu1 %246  ;;  %v1816_v16 = vpop.permute.xlu0 %281 }
  0xcf   :  { %v295_v15 = vmul.f32 %v1666_v29, %v247_v10  ;;  %v302_v55 = vmul.f32 %v1666_v29, %v1816_v16 }
  0xd0   :  { %v449_v20 = vpop.f32.mrf.mxu0  ;;  %1220 = vmatmul.msk.f32.gmra.mxu3 %vm359_vm0, %v696_v26 }
  0xd1   :  { %v311_v18 = vadd.f32 %v295_v15, %v180_v13  ;;  %v312_v13 = vadd.f32 %v296_v62, %v181_v3  ;;  %v323_v15 = vld [vmem:[%s2100_s3] sm:$0xff] }
  0xd3   :  { %v481_v27 = vadd.f32 %v449_v20, %v311_v18 }
  0xd5   :  { %v532_v9 = vpop.permute.xlu2 %531 }
  0xd6   :  { %v577_v23 = vadd.f32 %v532_v9, %v481_v27  ;;  %v1829_v36 = vpop.permute.xlu1 %546  ;;  %v512_v40 = vpop.permute.xlu0 %511 }
  0xd7   :  { %v573_v41 = vadd.f32 %v512_v40, %v477_v34 }
  0xd8   :  { %1261 = vtanh.f32 %v577_v23  ;;  %v452_v47 = vpop.f32.mrf.mxu0  ;;  %v325_v23 = vld [vmem:[%s2100_s3 + $0x10] sm:$0xff] }
  0xd9   :  { %v601_v48 = vmul.f32 0.5, %v573_v41  ;;  %1263 = vtanh.f32 %v603_v37  ;;  %v482_v21 = vadd.f32 %v452_v47, %v312_v13  ;;  %v318_v37 = vadd.f32 %v302_v55, %v187_v28  ;;  %v682_v28 = vld [vmem:[%s2099_s10 + $0x8] sm:$0xff] }
  0xdb   :  { %1265 = vtanh.f32 %v601_v48 }
  0xdc   :  { %1267 = vtanh.f32 %v587_v32 }
  0xdd   :  { %1269 = vtanh.f32 %v602_v52 }
  0xde   :  { %v1262_v53 = vpop.eup %1261  ;;  %v542_v19 = vpop.permute.xlu1 %541  ;;  %1271 = vtanh.f32 %v586_v60  ;;  %v186_v60 = vmul.f32 %v1668_v30, %v1785_v45  ;;  %v184_v45 = vmul.f32 %v1668_v30, %v1806_v5 }
  0xdf   :  { %v641_v38 = vmul.f32 %v1262_v53, %v597_v8  ;;  %v277_v61 = vpop.permute.xlu0 %276  ;;  %v1264_v1 = vpop.eup %1263  ;;  %1273 = vtanh.f32 %v604_v39  ;;  %v488_v8 = vadd.f32 %v470_v42, %v318_v37 }
  0xe0   :  { %v455_v54 = vpop.f32.mrf.mxu0  ;;  %v611_v12 = vmul.f32 0.5, %v1264_v1  ;;  %1275 = vtanh.f32 %v588_v4  ;;  %v301_v53 = vmul.f32 %v1666_v29, %v277_v61  ;;  %v681_v1 = vld [vmem:[%s2099_s10] sm:$0xff] }
  0xe1   :  { %v1266_v7 = vpop.eup %1265  ;;  %v483_v44 = vadd.f32 %v455_v54, %v313_v0  ;;  %1205 = vmatmul.msk.f32.vlgmr.msra.gmra.mxu1 %vm359_vm0, %v681_v1  ;;  %v661_v1 = vld [vmem:[%s2103_s9 + $0x20] sm:$0xff] }
  0xe2   :  { %v609_v10 = vmul.f32 0.5, %v1266_v7  ;;  %v1268_v14 = vpop.eup %1267  ;;  %v615_v57 = vadd.f32 0.5, %v611_v12 }
  0xe3   :  { %v579_v17 = vadd.f32 %v542_v19, %v483_v44  ;;  %v1270_v18 = vpop.eup %1269  ;;  %v595_v9 = vmul.f32 0.5, %v1268_v14 }
  0xe4   :  { %v613_v20 = vadd.f32 0.5, %v609_v10  ;;  %v1272_v27 = vpop.eup %1271  ;;  %v610_v16 = vmul.f32 0.5, %v1270_v18  ;;  %v639_v48 = vmul.f32 %v615_v57, %v325_v23  ;;  %v317_v10 = vadd.f32 %v301_v53, %v186_v60  ;;  %v685_v60 = vld [vmem:[%s2099_s10 + $0x20] sm:$0xff]  ;;  %v670_v53 = vld [vmem:[%s2103_s9 + $0x68] sm:$0xff] }
  0xe5   :  { %1277 = vtanh.f32 %v579_v17  ;;  %v1274_v46 = vpop.eup %1273  ;;  %v594_v41 = vmul.f32 0.5, %v1272_v27  ;;  %v599_v47 = vadd.f32 0.5, %v595_v9 }
  0xe6   :  { %v537_v25 = vpop.permute.xlu1 %536  ;;  %v637_v31 = vmul.f32 %v613_v20, %v323_v15  ;;  %v1276_v43 = vpop.eup %1275  ;;  %v614_v49 = vadd.f32 0.5, %v610_v16  ;;  %v612_v51 = vmul.f32 0.5, %v1274_v46  ;;  %v683_v16 = vld [vmem:[%s2099_s10 + $0x10] sm:$0xff] }
  0xe7   :  { %v578_v33 = vadd.f32 %v537_v25, %v482_v21  ;;  %v272_v34 = vpop.permute.xlu0 %271  ;;  %v598_v22 = vadd.f32 0.5, %v594_v41  ;;  %v596_v62 = vmul.f32 0.5, %v1276_v43  ;;  %v552_v15 = vpop.permute.xlu2 %551  ;;  %v487_v21 = vadd.f32 %v1848_v63, %v317_v10  ;;  %v666_v10 = vld [vmem:[%s2103_s9 + $0x48] sm:$0xff] }
  0xe8   :  { %v1866_v6 = vadd.f32 %v641_v38, %v637_v31  ;;  %v458_v40 = vpop.f32.mrf.mxu0  ;;  %v616_v54 = vadd.f32 0.5, %v612_v51 }
  0xe9   :  { %1279 = vtanh.f32 %v578_v33  ;;  %v484_v24 = vadd.f32 %v458_v40, %v1712_v58  ;;  %v300_v58 = vmul.f32 %v1666_v29, %v272_v34  ;;  %1206 = vmatmul.msk.f32.gmra.mxu1 %vm359_vm0, %v682_v28 }
  0xea   :  { %1161 = vst [vmem:[%s2101_s17] sm:$0xff] %v1866_v6 }
  0xeb   :  { %v1278_v32 = vpop.eup %1277  ;;  %v580_v52 = vadd.f32 %v1829_v36, %v484_v24  ;;  %v185_v36 = vmul.f32 %v1668_v30, %v1787_v50  ;;  %v600_v30 = vadd.f32 0.5, %v596_v62  ;;  %v671_v62 = vld [vmem:[%s2103_s9 + $0x70] sm:$0xff] }
  0xec   :  { %v643_v59 = vmul.f32 %v1278_v32, %v599_v47 }
  0xed   :  { %1281 = vtanh.f32 %v580_v52  ;;  %v316_v50 = vadd.f32 %v300_v58, %v185_v36  ;;  %v669_v58 = vld [vmem:[%s2103_s9 + $0x60] sm:$0xff]  ;;  %v687_v36 = vld [vmem:[%s2099_s10 + $0x30] sm:$0xff] }
  0xee   :  { %v567_v11 = vpop.permute.xlu1 %566  ;;  %v647_v38 = vadd.f32 %v643_v59, %v639_v48  ;;  %v657_v59 = vld [vmem:[%s2103_s9] sm:$0xff] }
  0xef   :  { %v1280_v19 = vpop.eup %1279  ;;  %v584_v39 = vadd.f32 %v567_v11, %v488_v8  ;;  %v267_v0 = vpop.permute.xlu0 %266  ;;  %v486_v18 = vadd.f32 %v1827_v35, %v316_v50  ;;  %v684_v8 = vld [vmem:[%s2099_s10 + $0x18] sm:$0xff]  ;;  %v686_v11 = vld [vmem:[%s2099_s10 + $0x28] sm:$0xff] }
  0xf0   :  { %v642_v4 = vmul.f32 %v1280_v19, %v598_v22  ;;  %v299_v61 = vmul.f32 %v1666_v29, %v267_v0  ;;  %v658_v22 = vld [vmem:[%s2103_s9 + $0x8] sm:$0xff]  ;;  %v659_v19 = vld [vmem:[%s2103_s9 + $0x10] sm:$0xff]  ;;  %v688_v0 = vld [vmem:[%s2099_s10 + $0x38] sm:$0xff] }
  0xf1   :  { %v324_v56 = vld [vmem:[%s2100_s3 + $0x8] sm:$0xff]  ;;  %v624_v7 = vmul.f32 0.5, %v584_v39  ;;  %1207 = vmatmul.msk.f32.gmra.mxu1 %vm359_vm0, %v683_v16  ;;  %v672_v39 = vld [vmem:[%s2103_s9 + $0x78] sm:$0xff] }
  0xf2   :  { %v638_v3 = vmul.f32 %v614_v49, %v324_v56  ;;  %1163 = vst [vmem:[%s2101_s17 + $0x10] sm:$0xff] %v647_v38  ;;  %v315_v14 = vadd.f32 %v299_v61, %v184_v45  ;;  %v662_v45 = vld [vmem:[%s2103_s9 + $0x28] sm:$0xff]  ;;  %v663_v61 = vld [vmem:[%s2103_s9 + $0x30] sm:$0xff]  ;;  %v664_v50 = vld [vmem:[%s2103_s9 + $0x38] sm:$0xff] }
  0xf3   :  { %1283 = vtanh.f32 %v624_v7  ;;  %v1282_v5 = vpop.eup %1281  ;;  %v692_v7 = vld [vmem:[%s2099_s10 + $0x58] sm:$0xff] }
  0xf4   :  { %v646_v13 = vadd.f32 %v642_v4, %v638_v3  ;;  %v485_v29 = vadd.f32 %v1801_v2, %v315_v14  ;;  %v644_v17 = vmul.f32 %v1282_v5, %v600_v30  ;;  %v689_v3 = vld [vmem:[%s2099_s10 + $0x40] sm:$0xff]  ;;  %v690_v4 = vld [vmem:[%s2099_s10 + $0x48] sm:$0xff]  ;;  %v668_v14 = vld [vmem:[%s2103_s9 + $0x58] sm:$0xff] }
  0xf6   :  { %v581_v55 = vadd.f32 %v552_v15, %v485_v29  ;;  %v557_v20 = vpop.permute.xlu1 %556 }
  0xf7   :  { %v582_v25 = vadd.f32 %v557_v20, %v486_v18  ;;  %v562_v27 = vpop.permute.xlu0 %561 }
  0xf8   :  { %v621_v9 = vmul.f32 0.5, %v581_v55  ;;  %v583_v31 = vadd.f32 %v562_v27, %v487_v21 }
  0xf9   :  { %v326_v44 = vld [vmem:[%s2100_s3 + $0x18] sm:$0xff]  ;;  %v1284_v2 = vpop.eup %1283  ;;  %v622_v35 = vmul.f32 0.5, %v582_v25  ;;  %1208 = vmatmul.msk.f32.gmra.mxu1 %vm359_vm0, %v684_v8 }
  0xfa   :  { %1162 = vst [vmem:[%s2101_s17 + $0x8] sm:$0xff] %v646_v13  ;;  %v640_v12 = vmul.f32 %v616_v54, %v326_v44  ;;  %v632_v33 = vmul.f32 0.5, %v1284_v2  ;;  %v623_v63 = vmul.f32 0.5, %v583_v31  ;;  %v691_v54 = vld [vmem:[%s2099_s10 + $0x50] sm:$0xff]  ;;  %v665_v44 = vld [vmem:[%s2103_s9 + $0x40] sm:$0xff] }
  0xfc   :  { %v648_v26 = vadd.f32 %v644_v17, %v640_v12  ;;  %v636_v34 = vadd.f32 0.5, %v632_v33  ;;  %v952_v33 = vpop.permute.xlu2 %951 }
  0xfe   :  { %1164 = vst [vmem:[%s2101_s17 + $0x18] sm:$0xff] %v648_v26  ;;  %1285 = vtanh.f32 %v648_v26  ;;  %v947_v28 = vpop.permute.xlu1 %946 }
  0xff   :  { %1287 = vtanh.f32 %v621_v9  ;;  %v942_v26 = vpop.permute.xlu0 %941 }
 0x100   :  { %1289 = vtanh.f32 %v622_v35 }
 0x101   :  { %1291 = vtanh.f32 %v623_v63  ;;  %1209 = vmatmul.msk.f32.gmra.mxu1 %vm359_vm0, %v685_v60 }
 0x102   :  { %1293 = vtanh.f32 %v1866_v6 }
 0x103   :  { %1295 = vtanh.f32 %v646_v13  ;;  %v667_v13 = vld [vmem:[%s2103_s9 + $0x50] sm:$0xff] }
 0x104   :  { %v1286_v57 = vpop.eup %1285  ;;  %1297 = vtanh.f32 %v647_v38  ;;  %v660_v38 = vld [vmem:[%s2103_s9 + $0x18] sm:$0xff] }
 0x105   :  { %v1288_v23 = vpop.eup %1287  ;;  %v656_v37 = vmul.f32 %v1286_v57, %v636_v34 }
 0x106   :  { %v1290_v40 = vpop.eup %1289  ;;  %v629_v46 = vmul.f32 0.5, %v1288_v23  ;;  %v962_v63 = vpop.permute.xlu1 %961 }
 0x107   :  { %v1292_v41 = vpop.eup %1291  ;;  %v630_v42 = vmul.f32 0.5, %v1290_v40  ;;  %886 = vmatpush.msra.mxu2 %v656_v37  ;;  %1156 = vst [vmem:[%s2102_s15 + $0x18] sm:$0xff] %v656_v37  ;;  %1245 = vmatpush.msra.mxu3 %v656_v37  ;;  %v2032_v2 = vpop.permute.xlu0 %956 }
 0x108   :  { %v631_v6 = vmul.f32 0.5, %v1292_v41  ;;  %v633_v24 = vadd.f32 0.5, %v629_v46  ;;  %v1294_v43 = vpop.eup %1293  ;;  %v967_v40 = vpop.permute.xlu2 %966 }
 0x109   :  { %v634_v47 = vadd.f32 0.5, %v630_v42  ;;  %v1296_v32 = vpop.eup %1295  ;;  %1210 = vmatmul.msk.f32.gmra.mxu1 %vm359_vm0, %v686_v11 }
 0x10a   :  { %v635_v48 = vadd.f32 0.5, %v631_v6  ;;  %v653_v49 = vmul.f32 %v1294_v43, %v633_v24  ;;  %v1298_v52 = vpop.eup %1297 }
 0x10b   :  { %v654_v56 = vmul.f32 %v1296_v32, %v634_v47 }
 0x10c   :  { %v655_v51 = vmul.f32 %v1298_v52, %v635_v48  ;;  %1153 = vst [vmem:[%s2102_s15] sm:$0xff] %v653_v49 }
 0x10d   :  { %1154 = vst [vmem:[%s2102_s15 + $0x8] sm:$0xff] %v654_v56 }
 0x10e   :  { %887 = vmatpush.msra.mxu2 %v655_v51  ;;  %1155 = vst [vmem:[%s2102_s15 + $0x10] sm:$0xff] %v655_v51  ;;  %1246 = vmatpush.msra.mxu3 %v655_v51  ;;  %v2036_v41 = vpop.permute.xlu1 %976 }
 0x10f   :  { %v972_v16 = vpop.permute.xlu0 %971 }
 0x110   :  { %888 = vmatpush.msra.mxu2 %v654_v56  ;;  %1247 = vmatpush.msra.mxu3 %v654_v56  ;;  %v982_v8 = vpop.permute.xlu2 %981 }
 0x111   :  { %1211 = vmatmul.msk.f32.gmra.mxu1 %vm359_vm0, %v687_v36 }
 0x112   :  { %889 = vmatpush.msra.mxu2 %v653_v49  ;;  %1248 = vmatpush.msra.mxu3 %v653_v49 }
 0x113   :  { %1221 = vmatmul.msk.f32.vlgmr.msra.gmra.mxu2 %vm359_vm0, %v657_v59  ;;  %1233 = vmatmul.msk.f32.vlgmr.msra.gmra.mxu3 %vm359_vm0, %v669_v58 }
 0x116   :  { %v2038_v59 = vpop.permute.xlu1 %991 }
 0x117   :  { %v987_v43 = vpop.permute.xlu0 %986 }
 0x119   :  { %1212 = vmatmul.msk.f32.gmra.mxu1 %vm359_vm0, %v688_v0 }
 0x11b   :  { %1222 = vmatmul.msk.f32.gmra.mxu2 %vm359_vm0, %v658_v22  ;;  %1234 = vmatmul.msk.f32.gmra.mxu3 %vm359_vm0, %v670_v53 }
 0x121   :  { %1213 = vmatmul.msk.f32.gmra.mxu1 %vm359_vm0, %v689_v3 }
 0x123   :  { %1223 = vmatmul.msk.f32.gmra.mxu2 %vm359_vm0, %v659_v19  ;;  %1235 = vmatmul.msk.f32.gmra.mxu3 %vm359_vm0, %v671_v62  ;;  %v1002_v19 = vpop.permute.xlu0 %1001 }
 0x129   :  { %1214 = vmatmul.msk.f32.gmra.mxu1 %vm359_vm0, %v690_v4 }
 0x12b   :  { %1224 = vmatmul.msk.f32.gmra.mxu2 %vm359_vm0, %v660_v38  ;;  %1236 = vmatmul.msk.f32.gmra.mxu3 %vm359_vm0, %v672_v39 }
 0x131   :  { %1215 = vmatmul.msk.f32.gmra.mxu1 %vm359_vm0, %v691_v54 }
 0x133   :  { %1225 = vmatmul.msk.f32.gmra.mxu2 %vm359_vm0, %v661_v1 }
 0x135   :  { %v814_v18 = vpop.f32.mrf.mxu3 }
 0x139   :  { %1216 = vmatmul.msk.f32.gmra.mxu1 %vm359_vm0, %v692_v7 }
 0x13b   :  { %1226 = vmatmul.msk.f32.gmra.mxu2 %vm359_vm0, %v662_v45 }
 0x13d   :  { %v817_v21 = vpop.f32.mrf.mxu3 }
 0x143   :  { %1227 = vmatmul.msk.f32.gmra.mxu2 %vm359_vm0, %v663_v61 }
 0x14b   :  { %1228 = vmatmul.msk.f32.gmra.mxu2 %vm359_vm0, %v664_v50  ;;  %v2030_v9 = vpop.f32.mrf.mxu3 }
 0x153   :  { %1229 = vmatmul.msk.f32.gmra.mxu2 %vm359_vm0, %v665_v44  ;;  %v2034_v34 = vpop.f32.mrf.mxu3  ;;  %v2040_v44 = vpop.permute.xlu2 %996 }
 0x15b   :  { %1230 = vmatmul.msk.f32.gmra.mxu2 %vm359_vm0, %v666_v10 }
 0x15e   :  { %v778_v30 = vpop.f32.mrf.mxu1 }
 0x163   :  { %1231 = vmatmul.msk.f32.gmra.mxu2 %vm359_vm0, %v667_v13 }
 0x166   :  { %v781_v5 = vpop.f32.mrf.mxu1 }
 0x16b   :  { %1232 = vmatmul.msk.f32.gmra.mxu2 %vm359_vm0, %v668_v14  ;;  %v1007_v14 = vpop.permute.xlu1 %1006 }
 0x16e   :  { %v784_v29 = vpop.f32.mrf.mxu1 }
 0x176   :  { %v2026_v15 = vpop.f32.mrf.mxu1 }
 0x17e   :  { %v790_v20 = vpop.f32.mrf.mxu1 }
 0x186   :  { %v793_v27 = vpop.f32.mrf.mxu1 }
 0x18e   :  { %v796_v35 = vpop.f32.mrf.mxu1 }
 0x196   :  { %v891_v12 = vpop.f32.mrf.mxu2  ;;  %v799_v23 = vpop.f32.mrf.mxu1 }
 0x197   :  { %v892_v42 = vadd.f32 %v891_v12, %v778_v30  ;;  %v927_v6 = vpop.f32.mrf.mxu3 }
 0x198   :  { %v928_v60 = vadd.f32 %v927_v6, %v814_v18  ;;  %v1012_v6 = vpop.permute.xlu2 %1011 }
 0x199   :  { %v1019_v47 = vadd.f32 %v942_v26, %v892_v42 }
 0x19a   :  { %v1031_v38 = vadd.f32 %v1002_v19, %v928_v60 }
 0x19b   :  { %v1035_v51 = vmul.f32 0.5, %v1019_v47 }
 0x19c   :  { %v1071_v10 = vmul.f32 0.5, %v1031_v38 }
 0x19e   :  { %v894_v17 = vpop.f32.mrf.mxu2  ;;  %v802_v56 = vpop.f32.mrf.mxu1 }
 0x19f   :  { %v895_v49 = vadd.f32 %v894_v17, %v781_v5  ;;  %v930_v53 = vpop.f32.mrf.mxu3 }
 0x1a0   :  { %v931_v45 = vadd.f32 %v930_v53, %v817_v21 }
 0x1a1   :  { %v1020_v22 = vadd.f32 %v947_v28, %v895_v49 }
 0x1a2   :  { %v1032_v5 = vadd.f32 %v1007_v14, %v931_v45 }
 0x1a3   :  { %v1036_v39 = vmul.f32 0.5, %v1020_v22 }
 0x1a6   :  { %v897_v55 = vpop.f32.mrf.mxu2  ;;  %v805_v61 = vpop.f32.mrf.mxu1 }
 0x1a7   :  { %v898_v11 = vadd.f32 %v897_v55, %v784_v29  ;;  %v933_v12 = vpop.f32.mrf.mxu3 }
 0x1a9   :  { %v1021_v4 = vadd.f32 %v952_v33, %v898_v11  ;;  %v1072_v33 = vmul.f32 0.5, %v1032_v5 }
 0x1ab   :  { %v1037_v29 = vmul.f32 0.5, %v1021_v4 }
 0x1ae   :  { %v2028_v25 = vpop.f32.mrf.mxu2 }
 0x1af   :  { %v901_v55 = vadd.f32 %v2028_v25, %v2026_v15 }
 0x1b1   :  { %v1022_v15 = vadd.f32 %v2032_v2, %v901_v55 }
 0x1b6   :  { %v903_v31 = vpop.f32.mrf.mxu2 }
 0x1b7   :  { %v904_v37 = vadd.f32 %v903_v31, %v790_v20 }
 0x1b9   :  { %v1023_v24 = vadd.f32 %v962_v63, %v904_v37 }
 0x1bb   :  { %v1051_v32 = vmul.f32 0.5, %v1023_v24 }
 0x1bd   :  { %1299 = vtanh.f32 %v1051_v32 }
 0x1be   :  { %v906_v57 = vpop.f32.mrf.mxu2  ;;  %1301 = vtanh.f32 %v1035_v51 }
 0x1bf   :  { %v907_v48 = vadd.f32 %v906_v57, %v793_v27  ;;  %v677_v27 = vld [vmem:[%s2104_s4] sm:$0xff]  ;;  %v934_v57 = vadd.f32 %v933_v12, %v2030_v9  ;;  %v1038_v9 = vmul.f32 0.5, %v1022_v15 }
 0x1c1   :  { %v1024_v58 = vadd.f32 %v967_v40, %v907_v48  ;;  %v1033_v32 = vadd.f32 %v1012_v6, %v934_v57 }
 0x1c3   :  { %v1052_v62 = vmul.f32 0.5, %v1024_v58  ;;  %v1300_v1 = vpop.eup %1299  ;;  %v1073_v22 = vmul.f32 0.5, %v1033_v32 }
 0x1c4   :  { %v1302_v54 = vpop.eup %1301  ;;  %v1059_v13 = vmul.f32 0.5, %v1300_v1  ;;  %v1017_v1 = vpop.permute.xlu0 %1016 }
 0x1c5   :  { %1303 = vtanh.f32 %v1052_v62  ;;  %v1043_v30 = vmul.f32 0.5, %v1302_v54 }
 0x1c6   :  { %v909_v46 = vpop.f32.mrf.mxu2  ;;  %1305 = vtanh.f32 %v1036_v39  ;;  %v1063_v20 = vadd.f32 0.5, %v1059_v13 }
 0x1c7   :  { %v910_v36 = vadd.f32 %v909_v46, %v796_v35  ;;  %v1047_v35 = vadd.f32 0.5, %v1043_v30  ;;  %v808_v46 = vpop.f32.mrf.mxu1 }
 0x1c8   :  { %v1087_v25 = vmul.f32 %v1063_v20, %v677_v27 }
 0x1c9   :  { %v1025_v50 = vadd.f32 %v972_v16, %v910_v36 }
 0x1cb   :  { %v1053_v17 = vmul.f32 0.5, %v1025_v50  ;;  %v1304_v26 = vpop.eup %1303 }
 0x1cc   :  { %v1306_v31 = vpop.eup %1305  ;;  %v1060_v37 = vmul.f32 0.5, %v1304_v26  ;;  %v1124_v32 = vpop.permute.xlu0 %1123 }
 0x1cd   :  { %v1044_v24 = vmul.f32 0.5, %v1306_v31 }
 0x1ce   :  { %v912_v52 = vpop.f32.mrf.mxu2 }
 0x1cf   :  { %v913_v18 = vadd.f32 %v912_v52, %v799_v23  ;;  %v936_v52 = vpop.f32.mrf.mxu3  ;;  %v1048_v58 = vadd.f32 0.5, %v1044_v24  ;;  %v811_v4 = vpop.f32.mrf.mxu1 }
 0x1d0   :  { %v937_v53 = vadd.f32 %v936_v52, %v2034_v34  ;;  %v1119_v24 = vpop.permute.xlu2 %1118 }
 0x1d1   :  { %v1026_v16 = vadd.f32 %v2036_v41, %v913_v18 }
 0x1d3   :  { %v1054_v48 = vmul.f32 0.5, %v1026_v16 }
 0x1d6   :  { %v915_v0 = vpop.f32.mrf.mxu2 }
 0x1d7   :  { %v916_v3 = vadd.f32 %v915_v0, %v802_v56  ;;  %v1064_v56 = vadd.f32 0.5, %v1060_v37 }
 0x1d9   :  { %v1027_v7 = vadd.f32 %v982_v8, %v916_v3 }
 0x1db   :  { %1307 = vtanh.f32 %v1027_v7 }
 0x1dc   :  { %1309 = vtanh.f32 %v1071_v10 }
 0x1dd   :  { %1311 = vtanh.f32 %v1037_v29 }
 0x1de   :  { %v918_v21 = vpop.f32.mrf.mxu2  ;;  %1313 = vtanh.f32 %v1053_v17 }
 0x1df   :  { %v919_v28 = vadd.f32 %v918_v21, %v805_v61  ;;  %v1034_v61 = vadd.f32 %v1017_v1, %v937_v53 }
 0x1e1   :  { %v1308_v63 = vpop.eup %1307  ;;  %v1028_v23 = vadd.f32 %v987_v43, %v919_v28  ;;  %v1074_v29 = vmul.f32 0.5, %v1034_v61 }
 0x1e2   :  { %v1091_v40 = vmul.f32 %v1308_v63, %v1047_v35  ;;  %v1310_v42 = vpop.eup %1309 }
 0x1e3   :  { %1315 = vtanh.f32 %v1028_v23  ;;  %v1312_v49 = vpop.eup %1311  ;;  %v1079_v43 = vmul.f32 0.5, %v1310_v42 }
 0x1e4   :  { %v1095_v47 = vadd.f32 %v1091_v40, %v1087_v25  ;;  %1317 = vtanh.f32 %v1072_v33  ;;  %v1314_v41 = vpop.eup %1313  ;;  %v1045_v3 = vmul.f32 0.5, %v1312_v49  ;;  %v1114_v40 = vpop.permute.xlu1 %1113 }
 0x1e5   :  { %v1061_v62 = vmul.f32 0.5, %v1314_v41  ;;  %v1083_v39 = vadd.f32 0.5, %v1079_v43 }
 0x1e6   :  { %1319 = vtanh.f32 %v1095_v47  ;;  %1165 = vst [vmem:[%s2105_s18] sm:$0xff] %v1095_v47  ;;  %v921_v2 = vpop.f32.mrf.mxu2  ;;  %v1049_v30 = vadd.f32 0.5, %v1045_v3 }
 0x1e7   :  { %v922_v8 = vadd.f32 %v921_v2, %v808_v46  ;;  %1321 = vtanh.f32 %v1054_v48  ;;  %v1065_v50 = vadd.f32 0.5, %v1061_v62 }
 0x1e8   :  { %1323 = vtanh.f32 %v1038_v9 }
 0x1e9   :  { %v1316_v60 = vpop.eup %1315  ;;  %v1029_v11 = vadd.f32 %v2038_v59, %v922_v8 }
 0x1ea   :  { %v1092_v36 = vmul.f32 %v1316_v60, %v1048_v58  ;;  %v1318_v38 = vpop.eup %1317 }
 0x1eb   :  { %1325 = vtanh.f32 %v1029_v11  ;;  %v1080_v7 = vmul.f32 0.5, %v1318_v38  ;;  %v1148_v11 = vpop.permute.xlu2 %1147 }
 0x1ec   :  { %v1320_v0 = vpop.eup %1319  ;;  %1327 = vtanh.f32 %v1073_v22  ;;  %v1129_v41 = vpop.permute.xlu1 %1128  ;;  %v1150_v62 = vperm.slane %v1148_v11, 0 }
 0x1ed   :  { %v678_v51 = vld [vmem:[%s2104_s4 + $0x8] sm:$0xff]  ;;  %v1103_v54 = vmul.f32 %v1320_v0, %v1083_v39  ;;  %v1322_v59 = vpop.eup %1321  ;;  %v1084_v21 = vadd.f32 0.5, %v1080_v7 }
 0x1ee   :  { %v1088_v19 = vmul.f32 %v1064_v56, %v678_v51  ;;  %v924_v34 = vpop.f32.mrf.mxu2  ;;  %v1324_v14 = vpop.eup %1323  ;;  %v1062_v18 = vmul.f32 0.5, %v1322_v59 }
 0x1ef   :  { %1157 = vst [vmem:[%s2106_s16] sm:$0xff] %v1103_v54  ;;  %v925_v13 = vadd.f32 %v924_v34, %v811_v4  ;;  %v1046_v27 = vmul.f32 0.5, %v1324_v14  ;;  %v1131_v49 = vmul.f32 %v1114_v40, %v1103_v54 }
 0x1f0   :  { %v1096_v45 = vadd.f32 %v1092_v36, %v1088_v19  ;;  %v1066_v35 = vadd.f32 0.5, %v1062_v18 }
 0x1f1   :  { %v1326_v5 = vpop.eup %1325  ;;  %v1030_v12 = vadd.f32 %v2040_v44, %v925_v13  ;;  %v1050_v63 = vadd.f32 0.5, %v1046_v27 }
 0x1f2   :  { %1329 = vtanh.f32 %v1096_v45  ;;  %1166 = vst [vmem:[%s2105_s18 + $0x8] sm:$0xff] %v1096_v45  ;;  %v1093_v55 = vmul.f32 %v1326_v5, %v1049_v30  ;;  %v1328_v20 = vpop.eup %1327 }
 0x1f3   :  { %1331 = vtanh.f32 %v1030_v12  ;;  %v1081_v33 = vmul.f32 0.5, %v1328_v20 }
 0x1f4   :  { %1333 = vtanh.f32 %v1074_v29 }
 0x1f5   :  { %v1085_v25 = vadd.f32 0.5, %v1081_v33 }
 0x1f8   :  { %v1330_v26 = vpop.eup %1329 }
 0x1f9   :  { %v679_v10 = vld [vmem:[%s2104_s4 + $0x10] sm:$0xff]  ;;  %v1104_v31 = vmul.f32 %v1330_v26, %v1084_v21  ;;  %v1332_v57 = vpop.eup %1331 }
 0x1fa   :  { %v1089_v17 = vmul.f32 %v1065_v50, %v679_v10  ;;  %v1094_v23 = vmul.f32 %v1332_v57, %v1050_v63  ;;  %v1334_v15 = vpop.eup %1333 }
 0x1fb   :  { %1158 = vst [vmem:[%s2106_s16 + $0x8] sm:$0xff] %v1104_v31  ;;  %v1082_v6 = vmul.f32 0.5, %v1334_v15  ;;  %v1132_v47 = vmul.f32 %v1119_v24, %v1104_v31 }
 0x1fc   :  { %v1097_v28 = vadd.f32 %v1093_v55, %v1089_v17 }
 0x1fd   :  { %v1086_v48 = vadd.f32 0.5, %v1082_v6  ;;  %v1135_v56 = vadd.f32 %v1132_v47, %v1131_v49 }
 0x1fe   :  { %1335 = vtanh.f32 %v1097_v28  ;;  %1167 = vst [vmem:[%s2105_s18 + $0x10] sm:$0xff] %v1097_v28 }
 0x204   :  { %v1336_v37 = vpop.eup %1335 }
 0x205   :  { %v680_v44 = vld [vmem:[%s2104_s4 + $0x18] sm:$0xff]  ;;  %v1105_v42 = vmul.f32 %v1336_v37, %v1085_v25 }
 0x206   :  { %v1090_v16 = vmul.f32 %v1066_v35, %v680_v44 }
 0x207   :  { %1159 = vst [vmem:[%s2106_s16 + $0x10] sm:$0xff] %v1105_v42  ;;  %v1133_v9 = vmul.f32 %v1124_v32, %v1105_v42 }
 0x208   :  { %v1098_v46 = vadd.f32 %v1094_v23, %v1090_v16 }
 0x209   :  { %v1136_v43 = vadd.f32 %v1135_v56, %v1133_v9 }
 0x20a   :  { %1337 = vtanh.f32 %v1098_v46  ;;  %1168 = vst [vmem:[%s2105_s18 + $0x18] sm:$0xff] %v1098_v46 }
 0x210   :  { %v1338_v52 = vpop.eup %1337 }
 0x211   :  { %v1106_v2 = vmul.f32 %v1338_v52, %v1086_v48 }
 0x213   :  { %v1134_v51 = vmul.f32 %v1129_v41, %v1106_v2  ;;  %1160 = vst [vmem:[%s2106_s16 + $0x18] sm:$0xff] %v1106_v2 }
 0x215   :  { %v1137_v8 = vadd.f32 %v1136_v43, %v1134_v51 }
 0x217   :  { %v1138_v58 = vrot.slane %v1137_v8, 4 }
 0x219   :  { %v1139_v60 = vadd.f32 %v1138_v58, %v1137_v8 }
 0x21b   :  { %v1140_v22 = vrot.slane %v1139_v60, 2 }
 0x21d   :  { %v1141_v53 = vadd.f32 %v1140_v22, %v1139_v60 }
 0x21f   :  { %v1142_v19 = vrot.slane %v1141_v53, 1 }
 0x221   :  { %v1143_v36 = vadd.f32 %v1142_v19, %v1141_v53 }
 0x223   :  { %v1151_v38 = vadd.f32 %v1150_v62, %v1143_v36 }
 0x225   :  { %1152 = vst [vmem:[%s2107_s14] sm:$0x1] %v1151_v38 }

</bundles_post_ra>
